<compile_context>
chip_gen: v5e
topology: v5e:2x2
jax: 0.10.0
libtpu: 0.0.40
codegen_flags: <defaults>
</compile_context>

<pallas_src>
import functools

import jax
import jax.numpy as jnp
import numpy as np
from jax.experimental import pallas as pl
from jax.experimental.pallas import tpu as pltpu


# ----------------------------------------------------------------------------
# Fused kernel: [ConvNormPool x2 + AdaptiveMaxPool1d(1)] + proj head,
# nb lane-batched samples per grid step.
# ----------------------------------------------------------------------------
def _parameterizer_kernel(x_ref, wconv_ref, vecs_ref, sel_ref, wp_ref, bp_ref,
                          o_ref, *, kernel_size, nb, d_embed, d_hidden):
    K = kernel_size
    D, Dh = d_embed, d_hidden
    f32 = jnp.float32

    def swish(h):
        return h * jax.nn.sigmoid(h)

    def softplus(h):
        # numerically stable softplus (max + log(1+exp(-|h|)); log1p would be
        # marginally more precise for large |h|).
        return jnp.maximum(h, 0.0) + jnp.log(1.0 + jnp.exp(-jnp.abs(h)))

    # ---- hoisted parameter loads (once per grid step, reused everywhere) ----
    wall = wconv_ref[...]                       # (Dh, K*D + 5*K*Dh)
    o0 = 0
    o1 = o0 + K * D
    o2 = o1 + K * Dh
    o3 = o2 + K * Dh
    o4 = o3 + K * Dh
    o5 = o4 + K * Dh
    o6 = o5 + K * Dh
    w1a, w1b0, w1b1 = wall[:, o0:o1], wall[:, o1:o2], wall[:, o2:o3]
    w2a, w2b0, w2b1 = wall[:, o3:o4], wall[:, o4:o5], wall[:, o5:o6]

    V = vecs_ref[...]                           # (Dh, 20)

    def col(j):
        return V[:, j:j + 1]                    # (Dh, 1), lane-broadcasts

    b1 = [col(0), col(1), col(2)]
    s1 = [col(3), col(4), col(5)]
    t1 = [col(6), col(7), col(8)]
    b2 = [col(9), col(10), col(11)]
    s2 = [col(12), col(13), col(14)]
    t2 = [col(15), col(16), col(17)]
    ps, pt = col(18), col(19)

    # ---- lane-batched conv helpers (position-major: column = t*nb + i) ----
    def conv(xin, w2d, bias):
        # xin: (Cin, P*nb); valid conv1d -> (Cout, (P-K+1)*nb) in ONE matmul.
        lout = xin.shape[1] // nb - K + 1
        xcol = jnp.concatenate(
            [xin[:, j * nb:(j + lout) * nb] for j in range(K)], axis=0)
        return jnp.dot(w2d, xcol, preferred_element_type=f32) + bias

    def causal_pad(h):
        # F.pad(h, (K-1, 0)): (K-1)*nb leading zero columns (no scratch ref).
        return jnp.concatenate(
            [jnp.zeros((h.shape[0], (K - 1) * nb), h.dtype), h], axis=1)

    def conv_norm_pool(xin, wa, wb0, wb1, b, s, t):
        c1 = conv(xin, wa, b[0])                      # valid conv
        h = swish(c1 * s[0] + t[0])
        h = conv(causal_pad(h), wb0, b[1])            # causal conv
        h = swish(h * s[1] + t[1])
        c3 = conv(causal_pad(h), wb1, b[2])           # causal conv
        return swish((c1 + c3) * s[2] + t[2])         # residual + BN + Swish

    # ------------------------------- encoder --------------------------------
    x = x_ref[0]                                             # (D, L*nb)
    h = conv_norm_pool(x, w1a, w1b0, w1b1, b1, s1, t1)       # (Dh, lout1*nb)

    # MaxPool1d(2): max with next position (VPU) + one even-position
    # decimation matmul (precomputed 0/1 matrix; default matmul precision
    # adds one bf16 rounding -- use precision=HIGHEST for exact parity).
    shl = jnp.concatenate([h[:, nb:], jnp.zeros((Dh, nb), h.dtype)], axis=1)
    m = jnp.maximum(h, shl)
    p = jnp.dot(m, sel_ref[...], preferred_element_type=f32)  # (Dh, lp1*nb)

    h = conv_norm_pool(p, w2a, w2b0, w2b1, b2, s2, t2)       # (Dh, lout2*nb)

    # MaxPool1d(2) + AdaptiveMaxPool1d(1) fused: global max over the
    # even-length prefix == elementwise max of the first 2*(lout2//2) slabs.
    lout2 = h.shape[1] // nb
    npref = 2 * (lout2 // 2)
    e = h[:, :nb]
    for tpos in range(1, npref):
        e = jnp.maximum(e, h[:, tpos * nb:(tpos + 1) * nb])  # (Dh, nb)

    # -- proj: BN(folded, eval) -> Swish -> Dropout(eval) -> Linear -> Softplus
    a = swish(e * ps + pt)                                   # (Dh, nb)
    logits = jnp.dot(wp_ref[...], a,
                     preferred_element_type=f32) + bp_ref[...]
    o_ref[0] = softplus(logits)                              # (H, nb)


# ----------------------------------------------------------------------------
# Wrapper: layout plumbing, parameter packing, pallas_call.
# ----------------------------------------------------------------------------
def _pick_block_batch(batch, max_nb=16):
    # Largest divisor of batch <= max_nb: maximize the lane width of the
    # batched matmuls (nsteps == 1 is fine on single-TC v5e/v6e).
    nb = 1
    for cand in range(1, min(batch, max_nb) + 1):
        if batch % cand == 0:
            nb = cand
    return nb


def parameterizer_forward(x, params, *, nb=None):
    B, L, D = x.shape
    Dh = params["w1a"].shape[0]
    K = params["w1a"].shape[1] // D
    H = params["wp"].shape[0]

    lout1 = L - K + 1
    lp1 = lout1 // 2
    lout2 = lp1 - K + 1
    assert lout1 >= 2 and lp1 >= K and lout2 >= 2, \
        "sequence too short for two ConvNormPool blocks"

    if nb is None:
        nb = _pick_block_batch(B)
    assert B % nb == 0
    nsteps = B // nb

    # (B, L, D) -> (nsteps, D, L*nb) with position-major columns (t*nb + i).
    # One fused XLA transpose; replaces the module's own x.transpose(-2, -1).
    xk = jnp.transpose(
        x.astype(jnp.float32).reshape(nsteps, nb, L, D), (0, 3, 2, 1)
    ).reshape(nsteps, D, L * nb)

    # Packed parameter streams.
    wconv = jnp.concatenate(
        [params["w1a"], params["w1b"][0], params["w1b"][1],
         params["w2a"], params["w2b"][0], params["w2b"][1]], axis=1)
    vecs = jnp.concatenate(
        [params["b1"][0], params["b1"][1], params["b1"][2],
         params["s1"][0], params["s1"][1], params["s1"][2],
         params["t1"][0], params["t1"][1], params["t1"][2],
         params["b2"][0], params["b2"][1], params["b2"][2],
         params["s2"][0], params["s2"][1], params["s2"][2],
         params["t2"][0], params["t2"][1], params["t2"][2],
         params["ps"], params["pt"]], axis=1)                 # (Dh, 20)
    wp, bp = params["wp"], params["bp"]

    # Host-precomputed MaxPool1d(2) even-position decimation matrix.
    r = np.arange(lout1 * nb)
    c = np.arange(lp1 * nb)
    sel = ((r[:, None] // nb == 2 * (c[None, :] // nb)) &
           (r[:, None] % nb == c[None, :] % nb)).astype(np.float32)
    sel = jnp.asarray(sel)                                    # (lout1*nb, lp1*nb)

    def const_spec(a):
        # Full-array block, constant index_map: fetched once, reused across grid.
        return pl.BlockSpec(a.shape, lambda b, _nd=a.ndim: (0,) * _nd)

    out = pl.pallas_call(
        functools.partial(_parameterizer_kernel, kernel_size=K, nb=nb,
                          d_embed=D, d_hidden=Dh),
        out_shape=jax.ShapeDtypeStruct((nsteps, H, nb), jnp.float32),
        grid=(nsteps,),
        in_specs=[pl.BlockSpec((1, D, L * nb), lambda b: (b, 0, 0)),
                  const_spec(wconv), const_spec(vecs), const_spec(sel),
                  const_spec(wp), const_spec(bp)],
        out_specs=pl.BlockSpec((1, H, nb), lambda b: (b, 0, 0)),
        compiler_params=pltpu.CompilerParams(
            dimension_semantics=("parallel",),
            # Tiny at these shapes; re-derive (<~48 MiB) when scaling nb/L on v7x.
            vmem_limit_bytes=32 * 1024 * 1024),
    )(xk, wconv, vecs, sel, wp, bp)

    # (nsteps, H, nb) -> (B, H): sample (step*nb + i) lives at out[step, :, i].
    return jnp.transpose(out, (0, 2, 1)).reshape(B, H)


# ----------------------------------------------------------------------------
# Deterministic synthetic parameters (no checkpoint)
# ----------------------------------------------------------------------------
def init_params(key, n_heads, d_embed, d_hidden, d_kernel):
    keys = jax.random.split(key, 22)

    def conv_w(k, cout, cin):
        # torch layout (Cout, Cin, K), stored pre-reshaped for im2col:
        #   w2d = w_torch.transpose(0, 2, 1).reshape(Cout, K*Cin)
        return 0.1 * jax.random.normal(k, (cout, d_kernel * cin), jnp.float32)

    def bn_fold(kg, kb, km, kv, n):
        gamma = 1.0 + 0.1 * jax.random.normal(kg, (n, d_hidden, 1), jnp.float32)
        beta = 0.1 * jax.random.normal(kb, (n, d_hidden, 1), jnp.float32)
        mean = 0.1 * jax.random.normal(km, (n, d_hidden, 1), jnp.float32)
        var = jax.random.uniform(kv, (n, d_hidden, 1), jnp.float32, 0.5, 1.5)
        scale = gamma / jnp.sqrt(var + 1e-5)
        shift = beta - mean * scale
        return scale, shift

    s1, t1 = bn_fold(keys[0], keys[1], keys[2], keys[3], 3)
    s2, t2 = bn_fold(keys[4], keys[5], keys[6], keys[7], 3)
    sp, tp = bn_fold(keys[8], keys[9], keys[10], keys[11], 1)

    return {
        # ConvNormPool block 1 (d_embed -> d_hidden)
        "w1a": conv_w(keys[12], d_hidden, d_embed),
        "w1b": jnp.stack([conv_w(keys[13], d_hidden, d_hidden),
                          conv_w(keys[14], d_hidden, d_hidden)]),
        "b1": 0.05 * jax.random.normal(keys[15], (3, d_hidden, 1), jnp.float32),
        "s1": s1, "t1": t1,
        # ConvNormPool block 2 (d_hidden -> d_hidden)
        "w2a": conv_w(keys[16], d_hidden, d_hidden),
        "w2b": jnp.stack([conv_w(keys[17], d_hidden, d_hidden),
                          conv_w(keys[18], d_hidden, d_hidden)]),
        "b2": 0.05 * jax.random.normal(keys[19], (3, d_hidden, 1), jnp.float32),
        "s2": s2, "t2": t2,
        # proj head: folded BatchNorm1d(d_hidden) + Linear(d_hidden, n_heads)
        "ps": sp[0], "pt": tp[0],
        "wp": 0.3 * jax.random.normal(keys[20], (n_heads, d_hidden), jnp.float32),
        "bp": 0.1 * jax.random.normal(keys[21], (n_heads, 1), jnp.float32),
    }


if __name__ == "__main__":
    batch, seqlen = 8, 16
    n_heads, d_embed, d_hidden, d_kernel = 4, 8, 16, 3

    key = jax.random.PRNGKey(0)
    kx, kp = jax.random.split(key, 2)

    x = jax.random.normal(kx, (batch, seqlen, d_embed), jnp.float32)
    params = init_params(kp, n_heads, d_embed, d_hidden, d_kernel)

    relevance_weights = jax.jit(parameterizer_forward)(x, params)
    jax.block_until_ready(relevance_weights)

    assert relevance_weights.shape == (batch, n_heads)
    assert bool(jnp.all(jnp.isfinite(relevance_weights)))
    assert bool(jnp.all(relevance_weights >= 0.0))   # Softplus output
    print("KERNEL_OK")
</pallas_src>

<mosaic_0001>
module attributes {stable_mosaic.version = 11 : i64} {
  func.func @_parameterizer_kernel(%arg0: i32, %arg1: memref<1x8x128xf32, #tpu.memory_space<vmem>>, %arg2: memref<16x264xf32, #tpu.memory_space<vmem>>, %arg3: memref<16x20xf32, #tpu.memory_space<vmem>>, %arg4: memref<112x56xf32, #tpu.memory_space<vmem>>, %arg5: memref<4x16xf32, #tpu.memory_space<vmem>>, %arg6: memref<4x1xf32, #tpu.memory_space<vmem>>, %arg7: memref<1x4x8xf32, #tpu.memory_space<vmem>>) attributes {dimension_semantics = [#tpu.dimension_semantics<parallel>], iteration_bounds = array<i64: 1>, scalar_prefetch = 0 : i64, scratch_operands = 0 : i64, tpu.core_type = #tpu.core_type<tc>, window_params = [{transform_indices = @transform_0, window_bounds = array<i64: 1, 8, 128>}, {pipeline_mode = #tpu.pipeline_mode<synchronous>, transform_indices = @transform_1, window_bounds = array<i64: 16, 264>}, {pipeline_mode = #tpu.pipeline_mode<synchronous>, transform_indices = @transform_2, window_bounds = array<i64: 16, 20>}, {pipeline_mode = #tpu.pipeline_mode<synchronous>, transform_indices = @transform_3, window_bounds = array<i64: 112, 56>}, {pipeline_mode = #tpu.pipeline_mode<synchronous>, transform_indices = @transform_4, window_bounds = array<i64: 4, 16>}, {pipeline_mode = #tpu.pipeline_mode<synchronous>, transform_indices = @transform_5, window_bounds = array<i64: 4, 1>}, {transform_indices = @transform_6, window_bounds = array<i64: 1, 4, 8>}]} {
    %c0 = arith.constant 0 : index
    %c0_0 = arith.constant 0 : index
    %0 = vector.load %arg2[%c0, %c0_0] : memref<16x264xf32, #tpu.memory_space<vmem>>, vector<16x264xf32>
    %1 = vector.extract_strided_slice %0 {offsets = [0, 0], sizes = [16, 24], strides = [1, 1]} : vector<16x264xf32> to vector<16x24xf32>
    %2 = vector.extract_strided_slice %0 {offsets = [0, 24], sizes = [16, 48], strides = [1, 1]} : vector<16x264xf32> to vector<16x48xf32>
    %3 = vector.extract_strided_slice %0 {offsets = [0, 72], sizes = [16, 48], strides = [1, 1]} : vector<16x264xf32> to vector<16x48xf32>
    %4 = vector.extract_strided_slice %0 {offsets = [0, 120], sizes = [16, 48], strides = [1, 1]} : vector<16x264xf32> to vector<16x48xf32>
    %5 = vector.extract_strided_slice %0 {offsets = [0, 168], sizes = [16, 48], strides = [1, 1]} : vector<16x264xf32> to vector<16x48xf32>
    %6 = vector.extract_strided_slice %0 {offsets = [0, 216], sizes = [16, 48], strides = [1, 1]} : vector<16x264xf32> to vector<16x48xf32>
    %c0_1 = arith.constant 0 : index
    %c0_2 = arith.constant 0 : index
    %7 = vector.load %arg3[%c0_1, %c0_2] : memref<16x20xf32, #tpu.memory_space<vmem>>, vector<16x20xf32>
    %8 = vector.extract_strided_slice %7 {offsets = [0, 0], sizes = [16, 1], strides = [1, 1]} : vector<16x20xf32> to vector<16x1xf32>
    %9 = vector.extract_strided_slice %7 {offsets = [0, 1], sizes = [16, 1], strides = [1, 1]} : vector<16x20xf32> to vector<16x1xf32>
    %10 = vector.extract_strided_slice %7 {offsets = [0, 2], sizes = [16, 1], strides = [1, 1]} : vector<16x20xf32> to vector<16x1xf32>
    %11 = vector.extract_strided_slice %7 {offsets = [0, 3], sizes = [16, 1], strides = [1, 1]} : vector<16x20xf32> to vector<16x1xf32>
    %12 = vector.extract_strided_slice %7 {offsets = [0, 4], sizes = [16, 1], strides = [1, 1]} : vector<16x20xf32> to vector<16x1xf32>
    %13 = vector.extract_strided_slice %7 {offsets = [0, 5], sizes = [16, 1], strides = [1, 1]} : vector<16x20xf32> to vector<16x1xf32>
    %14 = vector.extract_strided_slice %7 {offsets = [0, 6], sizes = [16, 1], strides = [1, 1]} : vector<16x20xf32> to vector<16x1xf32>
    %15 = vector.extract_strided_slice %7 {offsets = [0, 7], sizes = [16, 1], strides = [1, 1]} : vector<16x20xf32> to vector<16x1xf32>
    %16 = vector.extract_strided_slice %7 {offsets = [0, 8], sizes = [16, 1], strides = [1, 1]} : vector<16x20xf32> to vector<16x1xf32>
    %17 = vector.extract_strided_slice %7 {offsets = [0, 9], sizes = [16, 1], strides = [1, 1]} : vector<16x20xf32> to vector<16x1xf32>
    %18 = vector.extract_strided_slice %7 {offsets = [0, 10], sizes = [16, 1], strides = [1, 1]} : vector<16x20xf32> to vector<16x1xf32>
    %19 = vector.extract_strided_slice %7 {offsets = [0, 11], sizes = [16, 1], strides = [1, 1]} : vector<16x20xf32> to vector<16x1xf32>
    %20 = vector.extract_strided_slice %7 {offsets = [0, 12], sizes = [16, 1], strides = [1, 1]} : vector<16x20xf32> to vector<16x1xf32>
    %21 = vector.extract_strided_slice %7 {offsets = [0, 13], sizes = [16, 1], strides = [1, 1]} : vector<16x20xf32> to vector<16x1xf32>
    %22 = vector.extract_strided_slice %7 {offsets = [0, 14], sizes = [16, 1], strides = [1, 1]} : vector<16x20xf32> to vector<16x1xf32>
    %23 = vector.extract_strided_slice %7 {offsets = [0, 15], sizes = [16, 1], strides = [1, 1]} : vector<16x20xf32> to vector<16x1xf32>
    %24 = vector.extract_strided_slice %7 {offsets = [0, 16], sizes = [16, 1], strides = [1, 1]} : vector<16x20xf32> to vector<16x1xf32>
    %25 = vector.extract_strided_slice %7 {offsets = [0, 17], sizes = [16, 1], strides = [1, 1]} : vector<16x20xf32> to vector<16x1xf32>
    %26 = vector.extract_strided_slice %7 {offsets = [0, 18], sizes = [16, 1], strides = [1, 1]} : vector<16x20xf32> to vector<16x1xf32>
    %27 = vector.extract_strided_slice %7 {offsets = [0, 19], sizes = [16, 1], strides = [1, 1]} : vector<16x20xf32> to vector<16x1xf32>
    %c0_3 = arith.constant 0 : index
    %c0_4 = arith.constant 0 : index
    %c0_5 = arith.constant 0 : index
    %28 = vector.load %arg1[%c0_3, %c0_4, %c0_5] : memref<1x8x128xf32, #tpu.memory_space<vmem>>, vector<1x8x128xf32>
    %29 = vector.shape_cast %28 : vector<1x8x128xf32> to vector<8x128xf32>
    %30 = vector.extract_strided_slice %29 {offsets = [0, 0], sizes = [8, 112], strides = [1, 1]} : vector<8x128xf32> to vector<8x112xf32>
    %31 = vector.extract_strided_slice %29 {offsets = [0, 8], sizes = [8, 112], strides = [1, 1]} : vector<8x128xf32> to vector<8x112xf32>
    %32 = vector.extract_strided_slice %29 {offsets = [0, 16], sizes = [8, 112], strides = [1, 1]} : vector<8x128xf32> to vector<8x112xf32>
    %33 = tpu.concatenate %30, %31, %32 in 0 : vector<8x112xf32>, vector<8x112xf32>, vector<8x112xf32> -> vector<24x112xf32>
    %cst = arith.constant dense<0.000000e+00> : vector<16x112xf32>
    %34 = tpu.matmul %1, %33, %cst {dimension_numbers = #tpu.dot_dimension_numbers<[1], [0], [0], [1], [0, 0, 1, 1], [], []>} : vector<16x24xf32>, vector<24x112xf32>, vector<16x112xf32> -> vector<16x112xf32>
    %35 = vector.broadcast %8 : vector<16x1xf32> to vector<16x112xf32>
    %36 = arith.addf %34, %35 : vector<16x112xf32>
    %37 = vector.broadcast %11 : vector<16x1xf32> to vector<16x112xf32>
    %38 = arith.mulf %36, %37 : vector<16x112xf32>
    %39 = vector.broadcast %14 : vector<16x1xf32> to vector<16x112xf32>
    %40 = arith.addf %38, %39 : vector<16x112xf32>
    %41 = arith.negf %40 : vector<16x112xf32>
    %42 = math.exp %41 : vector<16x112xf32>
    %cst_6 = arith.constant 1.000000e+00 : f32
    %43 = vector.broadcast %cst_6 : f32 to vector<16x112xf32>
    %44 = arith.addf %43, %42 : vector<16x112xf32>
    %45 = arith.divf %43, %44 : vector<16x112xf32>
    %46 = arith.mulf %40, %45 : vector<16x112xf32>
    %cst_7 = arith.constant 0.000000e+00 : f32
    %47 = vector.broadcast %cst_7 : f32 to vector<16x16xf32>
    %48 = tpu.concatenate %47, %46 in 1 : vector<16x16xf32>, vector<16x112xf32> -> vector<16x128xf32>
    %49 = vector.extract_strided_slice %48 {offsets = [0, 0], sizes = [16, 112], strides = [1, 1]} : vector<16x128xf32> to vector<16x112xf32>
    %50 = vector.extract_strided_slice %48 {offsets = [0, 8], sizes = [16, 112], strides = [1, 1]} : vector<16x128xf32> to vector<16x112xf32>
    %51 = vector.extract_strided_slice %48 {offsets = [0, 16], sizes = [16, 112], strides = [1, 1]} : vector<16x128xf32> to vector<16x112xf32>
    %52 = tpu.concatenate %49, %50, %51 in 0 : vector<16x112xf32>, vector<16x112xf32>, vector<16x112xf32> -> vector<48x112xf32>
    %cst_8 = arith.constant dense<0.000000e+00> : vector<16x112xf32>
    %53 = tpu.matmul %2, %52, %cst_8 {dimension_numbers = #tpu.dot_dimension_numbers<[1], [0], [0], [1], [0, 0, 1, 1], [], []>} : vector<16x48xf32>, vector<48x112xf32>, vector<16x112xf32> -> vector<16x112xf32>
    %54 = vector.broadcast %9 : vector<16x1xf32> to vector<16x112xf32>
    %55 = arith.addf %53, %54 : vector<16x112xf32>
    %56 = vector.broadcast %12 : vector<16x1xf32> to vector<16x112xf32>
    %57 = arith.mulf %55, %56 : vector<16x112xf32>
    %58 = vector.broadcast %15 : vector<16x1xf32> to vector<16x112xf32>
    %59 = arith.addf %57, %58 : vector<16x112xf32>
    %60 = arith.negf %59 : vector<16x112xf32>
    %61 = math.exp %60 : vector<16x112xf32>
    %cst_9 = arith.constant 1.000000e+00 : f32
    %62 = vector.broadcast %cst_9 : f32 to vector<16x112xf32>
    %63 = arith.addf %62, %61 : vector<16x112xf32>
    %64 = arith.divf %62, %63 : vector<16x112xf32>
    %65 = arith.mulf %59, %64 : vector<16x112xf32>
    %cst_10 = arith.constant 0.000000e+00 : f32
    %66 = vector.broadcast %cst_10 : f32 to vector<16x16xf32>
    %67 = tpu.concatenate %66, %65 in 1 : vector<16x16xf32>, vector<16x112xf32> -> vector<16x128xf32>
    %68 = vector.extract_strided_slice %67 {offsets = [0, 0], sizes = [16, 112], strides = [1, 1]} : vector<16x128xf32> to vector<16x112xf32>
    %69 = vector.extract_strided_slice %67 {offsets = [0, 8], sizes = [16, 112], strides = [1, 1]} : vector<16x128xf32> to vector<16x112xf32>
    %70 = vector.extract_strided_slice %67 {offsets = [0, 16], sizes = [16, 112], strides = [1, 1]} : vector<16x128xf32> to vector<16x112xf32>
    %71 = tpu.concatenate %68, %69, %70 in 0 : vector<16x112xf32>, vector<16x112xf32>, vector<16x112xf32> -> vector<48x112xf32>
    %cst_11 = arith.constant dense<0.000000e+00> : vector<16x112xf32>
    %72 = tpu.matmul %3, %71, %cst_11 {dimension_numbers = #tpu.dot_dimension_numbers<[1], [0], [0], [1], [0, 0, 1, 1], [], []>} : vector<16x48xf32>, vector<48x112xf32>, vector<16x112xf32> -> vector<16x112xf32>
    %73 = vector.broadcast %10 : vector<16x1xf32> to vector<16x112xf32>
    %74 = arith.addf %72, %73 : vector<16x112xf32>
    %75 = arith.addf %36, %74 : vector<16x112xf32>
    %76 = vector.broadcast %13 : vector<16x1xf32> to vector<16x112xf32>
    %77 = arith.mulf %75, %76 : vector<16x112xf32>
    %78 = vector.broadcast %16 : vector<16x1xf32> to vector<16x112xf32>
    %79 = arith.addf %77, %78 : vector<16x112xf32>
    %80 = arith.negf %79 : vector<16x112xf32>
    %81 = math.exp %80 : vector<16x112xf32>
    %cst_12 = arith.constant 1.000000e+00 : f32
    %82 = vector.broadcast %cst_12 : f32 to vector<16x112xf32>
    %83 = arith.addf %82, %81 : vector<16x112xf32>
    %84 = arith.divf %82, %83 : vector<16x112xf32>
    %85 = arith.mulf %79, %84 : vector<16x112xf32>
    %86 = vector.extract_strided_slice %85 {offsets = [0, 8], sizes = [16, 104], strides = [1, 1]} : vector<16x112xf32> to vector<16x104xf32>
    %cst_13 = arith.constant 0.000000e+00 : f32
    %87 = vector.broadcast %cst_13 : f32 to vector<16x8xf32>
    %88 = tpu.concatenate %86, %87 in 1 : vector<16x104xf32>, vector<16x8xf32> -> vector<16x112xf32>
    %89 = arith.maximumf %85, %88 : vector<16x112xf32>
    %c0_14 = arith.constant 0 : index
    %c0_15 = arith.constant 0 : index
    %90 = vector.load %arg4[%c0_14, %c0_15] : memref<112x56xf32, #tpu.memory_space<vmem>>, vector<112x56xf32>
    %cst_16 = arith.constant dense<0.000000e+00> : vector<16x56xf32>
    %91 = tpu.matmul %89, %90, %cst_16 {dimension_numbers = #tpu.dot_dimension_numbers<[1], [0], [0], [1], [0, 0, 1, 1], [], []>} : vector<16x112xf32>, vector<112x56xf32>, vector<16x56xf32> -> vector<16x56xf32>
    %92 = vector.extract_strided_slice %91 {offsets = [0, 0], sizes = [16, 40], strides = [1, 1]} : vector<16x56xf32> to vector<16x40xf32>
    %93 = vector.extract_strided_slice %91 {offsets = [0, 8], sizes = [16, 40], strides = [1, 1]} : vector<16x56xf32> to vector<16x40xf32>
    %94 = vector.extract_strided_slice %91 {offsets = [0, 16], sizes = [16, 40], strides = [1, 1]} : vector<16x56xf32> to vector<16x40xf32>
    %95 = tpu.concatenate %92, %93, %94 in 0 : vector<16x40xf32>, vector<16x40xf32>, vector<16x40xf32> -> vector<48x40xf32>
    %cst_17 = arith.constant dense<0.000000e+00> : vector<16x40xf32>
    %96 = tpu.matmul %4, %95, %cst_17 {dimension_numbers = #tpu.dot_dimension_numbers<[1], [0], [0], [1], [0, 0, 1, 1], [], []>} : vector<16x48xf32>, vector<48x40xf32>, vector<16x40xf32> -> vector<16x40xf32>
    %97 = vector.broadcast %17 : vector<16x1xf32> to vector<16x40xf32>
    %98 = arith.addf %96, %97 : vector<16x40xf32>
    %99 = vector.broadcast %20 : vector<16x1xf32> to vector<16x40xf32>
    %100 = arith.mulf %98, %99 : vector<16x40xf32>
    %101 = vector.broadcast %23 : vector<16x1xf32> to vector<16x40xf32>
    %102 = arith.addf %100, %101 : vector<16x40xf32>
    %103 = arith.negf %102 : vector<16x40xf32>
    %104 = math.exp %103 : vector<16x40xf32>
    %cst_18 = arith.constant 1.000000e+00 : f32
    %105 = vector.broadcast %cst_18 : f32 to vector<16x40xf32>
    %106 = arith.addf %105, %104 : vector<16x40xf32>
    %107 = arith.divf %105, %106 : vector<16x40xf32>
    %108 = arith.mulf %102, %107 : vector<16x40xf32>
    %cst_19 = arith.constant 0.000000e+00 : f32
    %109 = vector.broadcast %cst_19 : f32 to vector<16x16xf32>
    %110 = tpu.concatenate %109, %108 in 1 : vector<16x16xf32>, vector<16x40xf32> -> vector<16x56xf32>
    %111 = vector.extract_strided_slice %110 {offsets = [0, 0], sizes = [16, 40], strides = [1, 1]} : vector<16x56xf32> to vector<16x40xf32>
    %112 = vector.extract_strided_slice %110 {offsets = [0, 8], sizes = [16, 40], strides = [1, 1]} : vector<16x56xf32> to vector<16x40xf32>
    %113 = vector.extract_strided_slice %110 {offsets = [0, 16], sizes = [16, 40], strides = [1, 1]} : vector<16x56xf32> to vector<16x40xf32>
    %114 = tpu.concatenate %111, %112, %113 in 0 : vector<16x40xf32>, vector<16x40xf32>, vector<16x40xf32> -> vector<48x40xf32>
    %cst_20 = arith.constant dense<0.000000e+00> : vector<16x40xf32>
    %115 = tpu.matmul %5, %114, %cst_20 {dimension_numbers = #tpu.dot_dimension_numbers<[1], [0], [0], [1], [0, 0, 1, 1], [], []>} : vector<16x48xf32>, vector<48x40xf32>, vector<16x40xf32> -> vector<16x40xf32>
    %116 = vector.broadcast %18 : vector<16x1xf32> to vector<16x40xf32>
    %117 = arith.addf %115, %116 : vector<16x40xf32>
    %118 = vector.broadcast %21 : vector<16x1xf32> to vector<16x40xf32>
    %119 = arith.mulf %117, %118 : vector<16x40xf32>
    %120 = vector.broadcast %24 : vector<16x1xf32> to vector<16x40xf32>
    %121 = arith.addf %119, %120 : vector<16x40xf32>
    %122 = arith.negf %121 : vector<16x40xf32>
    %123 = math.exp %122 : vector<16x40xf32>
    %cst_21 = arith.constant 1.000000e+00 : f32
    %124 = vector.broadcast %cst_21 : f32 to vector<16x40xf32>
    %125 = arith.addf %124, %123 : vector<16x40xf32>
    %126 = arith.divf %124, %125 : vector<16x40xf32>
    %127 = arith.mulf %121, %126 : vector<16x40xf32>
    %cst_22 = arith.constant 0.000000e+00 : f32
    %128 = vector.broadcast %cst_22 : f32 to vector<16x16xf32>
    %129 = tpu.concatenate %128, %127 in 1 : vector<16x16xf32>, vector<16x40xf32> -> vector<16x56xf32>
    %130 = vector.extract_strided_slice %129 {offsets = [0, 0], sizes = [16, 40], strides = [1, 1]} : vector<16x56xf32> to vector<16x40xf32>
    %131 = vector.extract_strided_slice %129 {offsets = [0, 8], sizes = [16, 40], strides = [1, 1]} : vector<16x56xf32> to vector<16x40xf32>
    %132 = vector.extract_strided_slice %129 {offsets = [0, 16], sizes = [16, 40], strides = [1, 1]} : vector<16x56xf32> to vector<16x40xf32>
    %133 = tpu.concatenate %130, %131, %132 in 0 : vector<16x40xf32>, vector<16x40xf32>, vector<16x40xf32> -> vector<48x40xf32>
    %cst_23 = arith.constant dense<0.000000e+00> : vector<16x40xf32>
    %134 = tpu.matmul %6, %133, %cst_23 {dimension_numbers = #tpu.dot_dimension_numbers<[1], [0], [0], [1], [0, 0, 1, 1], [], []>} : vector<16x48xf32>, vector<48x40xf32>, vector<16x40xf32> -> vector<16x40xf32>
    %135 = vector.broadcast %19 : vector<16x1xf32> to vector<16x40xf32>
    %136 = arith.addf %134, %135 : vector<16x40xf32>
    %137 = arith.addf %98, %136 : vector<16x40xf32>
    %138 = vector.broadcast %22 : vector<16x1xf32> to vector<16x40xf32>
    %139 = arith.mulf %137, %138 : vector<16x40xf32>
    %140 = vector.broadcast %25 : vector<16x1xf32> to vector<16x40xf32>
    %141 = arith.addf %139, %140 : vector<16x40xf32>
    %142 = arith.negf %141 : vector<16x40xf32>
    %143 = math.exp %142 : vector<16x40xf32>
    %cst_24 = arith.constant 1.000000e+00 : f32
    %144 = vector.broadcast %cst_24 : f32 to vector<16x40xf32>
    %145 = arith.addf %144, %143 : vector<16x40xf32>
    %146 = arith.divf %144, %145 : vector<16x40xf32>
    %147 = arith.mulf %141, %146 : vector<16x40xf32>
    %148 = vector.extract_strided_slice %147 {offsets = [0, 0], sizes = [16, 8], strides = [1, 1]} : vector<16x40xf32> to vector<16x8xf32>
    %149 = vector.extract_strided_slice %147 {offsets = [0, 8], sizes = [16, 8], strides = [1, 1]} : vector<16x40xf32> to vector<16x8xf32>
    %150 = arith.maximumf %148, %149 : vector<16x8xf32>
    %151 = vector.extract_strided_slice %147 {offsets = [0, 16], sizes = [16, 8], strides = [1, 1]} : vector<16x40xf32> to vector<16x8xf32>
    %152 = arith.maximumf %150, %151 : vector<16x8xf32>
    %153 = vector.extract_strided_slice %147 {offsets = [0, 24], sizes = [16, 8], strides = [1, 1]} : vector<16x40xf32> to vector<16x8xf32>
    %154 = arith.maximumf %152, %153 : vector<16x8xf32>
    %155 = vector.broadcast %26 : vector<16x1xf32> to vector<16x8xf32>
    %156 = arith.mulf %154, %155 : vector<16x8xf32>
    %157 = vector.broadcast %27 : vector<16x1xf32> to vector<16x8xf32>
    %158 = arith.addf %156, %157 : vector<16x8xf32>
    %159 = arith.negf %158 : vector<16x8xf32>
    %160 = math.exp %159 : vector<16x8xf32>
    %cst_25 = arith.constant 1.000000e+00 : f32
    %161 = vector.broadcast %cst_25 : f32 to vector<16x8xf32>
    %162 = arith.addf %161, %160 : vector<16x8xf32>
    %163 = arith.divf %161, %162 : vector<16x8xf32>
    %164 = arith.mulf %158, %163 : vector<16x8xf32>
    %c0_26 = arith.constant 0 : index
    %c0_27 = arith.constant 0 : index
    %165 = vector.load %arg5[%c0_26, %c0_27] : memref<4x16xf32, #tpu.memory_space<vmem>>, vector<4x16xf32>
    %cst_28 = arith.constant dense<0.000000e+00> : vector<4x8xf32>
    %166 = tpu.matmul %165, %164, %cst_28 {dimension_numbers = #tpu.dot_dimension_numbers<[1], [0], [0], [1], [0, 0, 1, 1], [], []>} : vector<4x16xf32>, vector<16x8xf32>, vector<4x8xf32> -> vector<4x8xf32>
    %c0_29 = arith.constant 0 : index
    %c0_30 = arith.constant 0 : index
    %167 = vector.load %arg6[%c0_29, %c0_30] : memref<4x1xf32, #tpu.memory_space<vmem>>, vector<4x1xf32>
    %168 = vector.broadcast %167 : vector<4x1xf32> to vector<4x8xf32>
    %169 = arith.addf %166, %168 : vector<4x8xf32>
    %cst_31 = arith.constant 0.000000e+00 : f32
    %170 = vector.broadcast %cst_31 : f32 to vector<4x8xf32>
    %171 = arith.maximumf %169, %170 : vector<4x8xf32>
    %172 = math.absf %169 : vector<4x8xf32>
    %cst_32 = arith.constant 0.000000e+00 : f32
    %173 = vector.broadcast %cst_32 : f32 to vector<4x8xf32>
    %174 = arith.subf %173, %172 : vector<4x8xf32>
    %175 = math.exp %174 : vector<4x8xf32>
    %cst_33 = arith.constant 1.000000e+00 : f32
    %176 = vector.broadcast %cst_33 : f32 to vector<4x8xf32>
    %177 = arith.addf %176, %175 : vector<4x8xf32>
    %178 = math.log %177 : vector<4x8xf32>
    %179 = arith.addf %171, %178 : vector<4x8xf32>
    %c0_34 = arith.constant 0 : index
    %c0_35 = arith.constant 0 : index
    %c0_36 = arith.constant 0 : index
    %180 = vector.load %arg7[%c0_34, %c0_35, %c0_36] : memref<1x4x8xf32, #tpu.memory_space<vmem>>, vector<1x4x8xf32>
    %181 = vector.shape_cast %180 : vector<1x4x8xf32> to vector<4x8xf32>
    %182 = vector.shape_cast %179 : vector<4x8xf32> to vector<1x4x8xf32>
    tpu.vector_store %arg7[%c0_34, %c0_35, %c0_36], %182 {strides = array<i32>} : memref<1x4x8xf32, #tpu.memory_space<vmem>>, vector<1x4x8xf32>,
    return
  }
  func.func @transform_0(%arg0: i32) -> (i32, i32, i32) {
    %c0_i32 = arith.constant 0 : i32
    %c0_i32_0 = arith.constant 0 : i32
    %c0_i32_1 = arith.constant 0 : i32
    return %arg0, %c0_i32, %c0_i32_0 : i32, i32, i32
  }
  func.func @transform_1(%arg0: i32) -> (i32, i32) {
    %c0_i32 = arith.constant 0 : i32
    %c0_i32_0 = arith.constant 0 : i32
    %c0_i32_1 = arith.constant 0 : i32
    return %c0_i32, %c0_i32_0 : i32, i32
  }
  func.func @transform_2(%arg0: i32) -> (i32, i32) {
    %c0_i32 = arith.constant 0 : i32
    %c0_i32_0 = arith.constant 0 : i32
    %c0_i32_1 = arith.constant 0 : i32
    return %c0_i32, %c0_i32_0 : i32, i32
  }
  func.func @transform_3(%arg0: i32) -> (i32, i32) {
    %c0_i32 = arith.constant 0 : i32
    %c0_i32_0 = arith.constant 0 : i32
    %c0_i32_1 = arith.constant 0 : i32
    return %c0_i32, %c0_i32_0 : i32, i32
  }
  func.func @transform_4(%arg0: i32) -> (i32, i32) {
    %c0_i32 = arith.constant 0 : i32
    %c0_i32_0 = arith.constant 0 : i32
    %c0_i32_1 = arith.constant 0 : i32
    return %c0_i32, %c0_i32_0 : i32, i32
  }
  func.func @transform_5(%arg0: i32) -> (i32, i32) {
    %c0_i32 = arith.constant 0 : i32
    %c0_i32_0 = arith.constant 0 : i32
    %c0_i32_1 = arith.constant 0 : i32
    return %c0_i32, %c0_i32_0 : i32, i32
  }
  func.func @transform_6(%arg0: i32) -> (i32, i32, i32) {
    %c0_i32 = arith.constant 0 : i32
    %c0_i32_0 = arith.constant 0 : i32
    %c0_i32_1 = arith.constant 0 : i32
    return %arg0, %c0_i32, %c0_i32_0 : i32, i32, i32
  }
}

</mosaic_0001>

<bundles_post_ra>
// kernel: parameterizer_forward.1
= control target key start
LH: loop header
LB: loop body
LE: loop exit
PB: predicated region body
PF: predicated region fallthrough
CT: control target
= control target key end

     0   :  { %s1531_s0 = inlined_call_operand.vmem [shape: f32[1,8,128], index: 0, kind: input, shape index: {}]   ;;  %s1532_s1 = inlined_call_operand.vmem [shape: f32[16,264], index: 1, kind: input, shape index: {}]   ;;  %s1533_s2 = inlined_call_operand.vmem [shape: f32[16,20], index: 2, kind: input, shape index: {}]   ;;  %s1534_s3 = inlined_call_operand.vmem [shape: f32[112,56], index: 3, kind: input, shape index: {}]   ;;  %s1535_s4 = inlined_call_operand.vmem [shape: f32[4,16], index: 4, kind: input, shape index: {}]   ;;  %s1536_s5 = inlined_call_operand.vmem [shape: f32[4,1], index: 5, kind: input, shape index: {}]   ;;  %s1537_s6 = inlined_call_operand.hbm [shape: f32[1,4,8], index: 6, kind: output, shape index: {}]  }
   0x1   :  { %v32_v0 = vld [vmem:[%s1531_s0] sm:$0xff] }
   0x2   :  { %11 = vsyncpa [#allocation3], 0  ;;  %s1220_s23 = smov 112   ;;  %s1221_s24 = smov 120   ;;  %v1222_v1 = vmov 0   ;;  %v1293_v2 = vld [vmem:[%s1533_s2 + $0x8] sm:$0xff] }
   0x3   :  { %37 = vrot.lane.b32.xlu0 %v32_v0, %s1220_s23  ;;  %1043 = vset.pattern.permute.xlu1 %v1222_v1  ;;  %v1299_v3 = vld [vmem:[%s1533_s2] sm:$0xff]  ;;  %v1223_v4 = vmov 6   ;;  %v1224_v5 = vmov 3   ;;  %vm50_vm0 = vcmask 195584   ;;  %v1315_v9 = vld [vmem:[%s1532_s1 + $0x18] sm:$0xff]  ;;  %s1225_s8 = smov 16  }
   0x4   :  { %47 = vperm.xlu1 %1043, %v1293_v2   ;;  %1044 = vset.pattern.permute.xlu2 %v1224_v5  ;;  %v1309_v8 = vld [vmem:[%s1532_s1] sm:$0xff]  ;;  %s1226_s9 = smov 104   ;;  %vm148_vm9 = vcmask 130048   ;;  %v1227_v60 = vmov 1   ;;  %v1228_v61 = vmov 4   ;;  %v1229_v62 = vmov 7  }
   0x5   :  { %85 = vperm.xlu2 %1044, %v1293_v2   ;;  %1045 = vset.pattern.permute.xlu0 %v1223_v4  ;;  %vm1341_vm10 = vmneg %vm148_vm9  ;;  %vm177_vm11 = vcmask 392192   ;;  %s1230_s10 = smov 56   ;;  %s1234_s18 = smov 8  }
   0x6   :  { %s1238_s22 = smov 88   ;;  %s1242_s25 = smov 40  }
   0xb   :  { %34 = vrot.lane.b32.xlu0 %v32_v0, %s1221_s24 }
   0xc   :  { %42 = vperm.xlu1 %1043, %v1299_v3  }
   0xd   :  { %81 = vperm.xlu2 %1044, %v1299_v3  }
  0x13   :  { %95 = vperm.xlu0 %1045, %v1293_v2  }
  0x14   :  { %1046 = vset.pattern.permute.xlu1 %v1223_v4 }
  0x15   :  { %91 = vperm.xlu1 %1046, %v1299_v3   ;;  %1059 = vset.pattern.permute.xlu2 %v1228_v61 }
  0x1b   :  { %1057 = vset.pattern.permute.xlu0 %v1227_v60 }
  0x1d   :  { %1058 = vset.pattern.permute.xlu1 %v1227_v60  ;;  %v1232_v60 = vmov 5  }
  0x5f   :  { %v86_v11 = vpop.permute.xlu2 %85 }
  0x67   :  { %v82_v15 = vpop.permute.xlu2 %81 }
  0x75   :  { %v38_v6 = vpop.permute.xlu0 %37 }
  0x76   :  { %70 = vmatpush.msra.mxu0 %v38_v6  ;;  %v48_v10 = vpop.permute.xlu1 %47 }
  0x7d   :  { %v35_v7 = vpop.permute.xlu0 %34 }
  0x7e   :  { %71 = vmatpush.msra.mxu0 %v35_v7  ;;  %v43_v12 = vpop.permute.xlu1 %42 }
  0x80   :  { %72 = vmatpush.msra.mxu0 %v32_v0 }
  0x81   :  { %969 = vmatmul.msk.f32.vlgmr.msra.gmra.mxu0 %vm50_vm0, %v1309_v8 }
  0x85   :  { %v96_v22 = vpop.permute.xlu0 %95 }
  0x87   :  { %v92_v16 = vpop.permute.xlu1 %91 }
  0x89   :  { %970 = vmatmul.msk.f32.gmra.mxu0 %vm50_vm0, %v1315_v9 }
  0xfe   :  { %v74_v13 = vpop.f32.mrf.mxu0 }
  0xff   :  { %v1318_v14 = vadd.f32 %v74_v13, %v43_v12 }
 0x101   :  { %v88_v17 = vmul.f32 %v82_v15, %v1318_v14 }
 0x103   :  { %v98_v18 = vadd.f32 %v92_v16, %v88_v17 }
 0x105   :  { %v971_v19 = vmul.f32 -1.442695, %v98_v18 }
 0x106   :  { %v77_v20 = vpop.f32.mrf.mxu0 }
 0x107   :  { %1132 = vpow2.f32 %v971_v19  ;;  %v1321_v21 = vadd.f32 %v77_v20, %v48_v10 }
 0x109   :  { %v89_v23 = vmul.f32 %v86_v11, %v1321_v21 }
 0x10b   :  { %v99_v24 = vadd.f32 %v96_v22, %v89_v23 }
 0x10d   :  { %v1133_v25 = vpop.eup %1132  ;;  %v972_v26 = vmul.f32 -1.442695, %v99_v24 }
 0x10e   :  { %v106_v27 = vadd.f32 1.0, %v1133_v25 }
 0x10f   :  { %1134 = vpow2.f32 %v972_v26 }
 0x110   :  { %1136 = vrcp.f32 %v106_v27  ;;  %v119_v33 = vand.u32 2147483648, %v106_v27  ;;  %v117_v35 = vand.u32 2147483647, %v106_v27  ;;  %vm113_vm2 = vweird.f32 %v106_v27 }
 0x112   :  { %v120_v38 = vor.u32 1.1754944e-38, %v119_v33  ;;  %vm118_vm4 = vcmp.eq.f32.partialorder %v117_v35, 8.507059e+37 }
 0x115   :  { %v1135_v28 = vpop.eup %1134 }
 0x116   :  { %v1137_v29 = vpop.eup %1136  ;;  %v107_v30 = vadd.f32 1.0, %v1135_v28 }
 0x117   :  { %v109_v31 = vmul.f32 %v1137_v29, %v106_v27  ;;  %vm114_vm1 = vweird.f32 %v1137_v29 }
 0x118   :  { %1138 = vrcp.f32 %v107_v30  ;;  %vm115_vm3 = vmor %vm113_vm2, %vm114_vm1  ;;  %v134_v44 = vand.u32 2147483648, %v107_v30  ;;  %v132_v46 = vand.u32 2147483647, %v107_v30  ;;  %vm128_vm6 = vweird.f32 %v107_v30 }
 0x119   :  { %v110_v32 = vsub.f32 1.0, %v109_v31 }
 0x11a   :  { %v135_v48 = vor.u32 1.1754944e-38, %v134_v44  ;;  %vm133_vm8 = vcmp.eq.f32.partialorder %v132_v46, 8.507059e+37 }
 0x11b   :  { %v111_v34 = vmul.f32 %v1137_v29, %v110_v32 }
 0x11d   :  { %v112_v36 = vadd.f32 %v1137_v29, %v111_v34 }
 0x11e   :  { %v1139_v37 = vpop.eup %1138 }
 0x11f   :  { %v116_v39 = vsel %vm115_vm3, %v1137_v29, %v112_v36  ;;  %v124_v40 = vmul.f32 %v1139_v37, %v107_v30  ;;  %vm129_vm5 = vweird.f32 %v1139_v37 }
 0x120   :  { %v121_v41 = vsel %vm118_vm4, %v120_v38, %v116_v39  ;;  %vm130_vm7 = vmor %vm128_vm6, %vm129_vm5 }
 0x121   :  { %v138_v42 = vmul.f32 %v121_v41, %v98_v18  ;;  %v125_v43 = vsub.f32 1.0, %v124_v40 }
 0x123   :  { %v126_v45 = vmul.f32 %v1139_v37, %v125_v43  ;;  %142 = vrot.lane.b32.xlu1 %v138_v42, %s1225_s8 }
 0x125   :  { %v127_v47 = vadd.f32 %v1139_v37, %v126_v45 }
 0x127   :  { %v131_v49 = vsel %vm130_vm7, %v1139_v37, %v127_v47 }
 0x128   :  { %v136_v50 = vsel %vm133_vm8, %v135_v48, %v131_v49 }
 0x129   :  { %v139_v51 = vmul.f32 %v136_v50, %v99_v24 }
 0x12b   :  { %144 = vrot.lane.b32.xlu2 %v139_v51, %s1225_s8  ;;  %173 = vrot.lane.b32.xlu1 %v1309_v8, %s1226_s9 }
 0x133   :  { %166 = vperm.xlu1 %1058, %v1299_v3  }
 0x13b   :  { %1060 = vset.pattern.permute.xlu1 %v1228_v61  ;;  %v1233_v61 = vmov 2  }
 0x13c   :  { %206 = vperm.xlu1 %1060, %v1299_v3  }
 0x185   :  { %v145_v52 = vpop.permute.xlu2 %144 }
 0x186   :  { %v150_v54 = vsel %vm148_vm9, 0.0, %v145_v52 }
 0x195   :  { %v143_v53 = vpop.permute.xlu1 %142 }
 0x196   :  { %v149_v55 = vsel %vm148_vm9, 0.0, %v143_v53 }
 0x197   :  { %v1052_v56 = vpack.i.bf16 %v149_v55, %v150_v54 }
 0x199   :  { %1053 = vrot.lane.b32.xlu0 %v1052_v56, %s1221_s24  ;;  %1048 = vrot.lane.b32.xlu2 %v1052_v56, %s1220_s23 }
 0x19d   :  { %v174_v6 = vpop.permute.xlu1 %173 }
 0x1a1   :  { %175 = vrot.lane.b32.xlu2 %v1315_v9, %s1226_s9  ;;  %170 = vperm.xlu0 %1057, %v1293_v2  }
 0x1a5   :  { %v167_v10 = vpop.permute.xlu1 %166 }
 0x1a9   :  { %210 = vperm.xlu2 %1059, %v1293_v2   ;;  %1062 = vset.pattern.permute.xlu0 %v1229_v62 }
 0x1aa   :  { %216 = vperm.xlu0 %1062, %v1299_v3  }
 0x1ae   :  { %v207_v12 = vpop.permute.xlu1 %206 }
 0x1b1   :  { %1061 = vset.pattern.permute.xlu2 %v1229_v62 }
 0x1b2   :  { %220 = vperm.xlu2 %1061, %v1293_v2   ;;  %297 = vrot.lane.b32.xlu0 %v1309_v8, %s1230_s10 }
 0x1b3   :  { %1074 = vset.pattern.permute.xlu0 %v1232_v60 }
 0x1ba   :  { %331 = vperm.xlu0 %1074, %v1299_v3   ;;  %1073 = vset.pattern.permute.xlu2 %v1233_v61 }
 0x1f3   :  { %v1049_v57 = vpop.permute.xlu2 %1048 }
 0x1f4   :  { %v1050_v58 = vunpack.i.l.bf16 %v1049_v57  ;;  %v1051_v59 = vunpack.i.h.bf16 %v1049_v57 }
 0x1f6   :  { %192 = vmatpush.msra.mxu1 %v1050_v58 }
 0x1f8   :  { %193 = vmatpush.msra.mxu1 %v1051_v59  ;;  %v1231_v59 = vmov 8  }
 0x1f9   :  { %1075 = vset.pattern.permute.xlu1 %v1231_v59 }
 0x1fb   :  { %v176_v7 = vpop.permute.xlu2 %175 }
 0x203   :  { %v211_v15 = vpop.permute.xlu2 %210 }
 0x20b   :  { %v1054_v63 = vpop.permute.xlu0 %1053 }
 0x20c   :  { %v1055_v0 = vunpack.i.l.bf16 %v1054_v63  ;;  %v1056_v4 = vunpack.i.h.bf16 %v1054_v63  ;;  %v221_v24 = vpop.permute.xlu2 %220 }
 0x20e   :  { %194 = vmatpush.msra.mxu1 %v1055_v0 }
 0x210   :  { %195 = vmatpush.msra.mxu1 %v1056_v4 }
 0x212   :  { %974 = vmatpush.msk.msra.mxu1 %vm1341_vm10, %v145_v52 }
 0x213   :  { %v171_v11 = vpop.permute.xlu0 %170 }
 0x214   :  { %976 = vmatpush.msk.msra.mxu1 %vm1341_vm10, %v143_v53 }
 0x215   :  { %977 = vmatmul.msk.f32.vlgmr.msra.gmra.mxu1 %vm177_vm11, %v174_v6 }
 0x21c   :  { %v217_v17 = vpop.permute.xlu0 %216 }
 0x21d   :  { %978 = vmatmul.msk.f32.gmra.mxu1 %vm177_vm11, %v176_v7 }
 0x292   :  { %v199_v13 = vpop.f32.mrf.mxu1 }
 0x293   :  { %v200_v16 = vadd.f32 %v199_v13, %v167_v10  ;;  %v298_v10 = vpop.permute.xlu0 %297 }
 0x295   :  { %v213_v18 = vmul.f32 %v207_v12, %v200_v16 }
 0x297   :  { %v223_v19 = vadd.f32 %v217_v17, %v213_v18 }
 0x299   :  { %v979_v20 = vmul.f32 -1.442695, %v223_v19 }
 0x29a   :  { %v202_v22 = vpop.f32.mrf.mxu1 }
 0x29b   :  { %1140 = vpow2.f32 %v979_v20  ;;  %v203_v23 = vadd.f32 %v202_v22, %v171_v11  ;;  %v332_v17 = vpop.permute.xlu0 %331 }
 0x29d   :  { %v214_v25 = vmul.f32 %v211_v15, %v203_v23 }
 0x29f   :  { %v224_v26 = vadd.f32 %v221_v24, %v214_v25 }
 0x2a1   :  { %v1141_v27 = vpop.eup %1140  ;;  %v980_v28 = vmul.f32 -1.442695, %v224_v26 }
 0x2a2   :  { %v231_v29 = vadd.f32 1.0, %v1141_v27 }
 0x2a3   :  { %1142 = vpow2.f32 %v980_v28 }
 0x2a4   :  { %1144 = vrcp.f32 %v231_v29  ;;  %v244_v35 = vand.u32 2147483648, %v231_v29  ;;  %v242_v37 = vand.u32 2147483647, %v231_v29  ;;  %vm238_vm13 = vweird.f32 %v231_v29 }
 0x2a6   :  { %v245_v40 = vor.u32 1.1754944e-38, %v244_v35  ;;  %vm243_vm15 = vcmp.eq.f32.partialorder %v242_v37, 8.507059e+37  ;;  %v413_v35 = vld [vmem:[%s1534_s3 + $0x50] sm:$0xff]  ;;  %v411_v37 = vld [vmem:[%s1534_s3 + $0x40] sm:$0xff] }
 0x2a9   :  { %v1143_v30 = vpop.eup %1142 }
 0x2aa   :  { %v1145_v31 = vpop.eup %1144  ;;  %v232_v32 = vadd.f32 1.0, %v1143_v30 }
 0x2ab   :  { %v234_v33 = vmul.f32 %v1145_v31, %v231_v29  ;;  %vm239_vm12 = vweird.f32 %v1145_v31 }
 0x2ac   :  { %1146 = vrcp.f32 %v232_v32  ;;  %vm240_vm14 = vmor %vm238_vm13, %vm239_vm12  ;;  %v259_v46 = vand.u32 2147483648, %v232_v32  ;;  %v257_v48 = vand.u32 2147483647, %v232_v32  ;;  %vm253_vm1 = vweird.f32 %v232_v32 }
 0x2ad   :  { %v235_v34 = vsub.f32 1.0, %v234_v33 }
 0x2ae   :  { %v260_v50 = vor.u32 1.1754944e-38, %v259_v46  ;;  %vm258_vm3 = vcmp.eq.f32.partialorder %v257_v48, 8.507059e+37 }
 0x2af   :  { %v236_v36 = vmul.f32 %v1145_v31, %v235_v34 }
 0x2b1   :  { %v237_v38 = vadd.f32 %v1145_v31, %v236_v36  ;;  %v412_v36 = vld [vmem:[%s1534_s3 + $0x48] sm:$0xff] }
 0x2b2   :  { %v1147_v39 = vpop.eup %1146 }
 0x2b3   :  { %v241_v41 = vsel %vm240_vm14, %v1145_v31, %v237_v38  ;;  %v249_v42 = vmul.f32 %v1147_v39, %v232_v32  ;;  %vm254_vm0 = vweird.f32 %v1147_v39  ;;  %v416_v31 = vld [vmem:[%s1534_s3 + $0x68] sm:$0xff] }
 0x2b4   :  { %v246_v43 = vsel %vm243_vm15, %v245_v40, %v241_v41  ;;  %vm255_vm2 = vmor %vm253_vm1, %vm254_vm0  ;;  %426 = vmatpush.msra.mxu3 %v416_v31  ;;  %vm398_vm15 = vcmask 850944   ;;  %vm417_vm0 = vcmask 916480   ;;  %vm479_vm1 = vcmask 64512  }
 0x2b5   :  { %v263_v44 = vmul.f32 %v246_v43, %v223_v19  ;;  %v250_v45 = vsub.f32 1.0, %v249_v42  ;;  %v409_v43 = vld [vmem:[%s1534_s3 + $0x30] sm:$0xff] }
 0x2b7   :  { %v251_v47 = vmul.f32 %v1147_v39, %v250_v45  ;;  %267 = vrot.lane.b32.xlu2 %v263_v44, %s1225_s8  ;;  %v408_v45 = vld [vmem:[%s1534_s3 + $0x28] sm:$0xff] }
 0x2b9   :  { %v252_v49 = vadd.f32 %v1147_v39, %v251_v47 }
 0x2bb   :  { %v256_v51 = vsel %vm255_vm2, %v1147_v39, %v252_v49  ;;  %v410_v39 = vld [vmem:[%s1534_s3 + $0x38] sm:$0xff]  ;;  %v407_v49 = vld [vmem:[%s1534_s3 + $0x20] sm:$0xff] }
 0x2bc   :  { %v261_v52 = vsel %vm258_vm3, %v260_v50, %v256_v51  ;;  %v406_v51 = vld [vmem:[%s1534_s3 + $0x18] sm:$0xff] }
 0x2bd   :  { %v264_v53 = vmul.f32 %v261_v52, %v224_v26 }
 0x2bf   :  { %269 = vrot.lane.b32.xlu1 %v264_v53, %s1225_s8 }
 0x311   :  { %v268_v54 = vpop.permute.xlu2 %267 }
 0x312   :  { %v273_v56 = vsel %vm148_vm9, 0.0, %v268_v54 }
 0x331   :  { %v270_v55 = vpop.permute.xlu1 %269 }
 0x332   :  { %v274_v57 = vsel %vm148_vm9, 0.0, %v270_v55 }
 0x333   :  { %v1068_v58 = vpack.i.bf16 %v273_v56, %v274_v57  ;;  %v405_v56 = vld [vmem:[%s1534_s3 + $0x10] sm:$0xff] }
 0x335   :  { %1069 = vrot.lane.b32.xlu2 %v1068_v58, %s1221_s24  ;;  %1064 = vrot.lane.b32.xlu1 %v1068_v58, %s1220_s23 }
 0x33d   :  { %299 = vrot.lane.b32.xlu1 %v1315_v9, %s1230_s10  ;;  %290 = vperm.xlu2 %1073, %v1299_v3  }
 0x345   :  { %341 = vperm.xlu1 %1075, %v1299_v3   ;;  %294 = vperm.xlu2 %1073, %v1293_v2  }
 0x34d   :  { %1076 = vset.pattern.permute.xlu1 %v1232_v60  ;;  %1077 = vset.pattern.permute.xlu2 %v1231_v59 }
 0x34e   :  { %335 = vperm.xlu1 %1076, %v1293_v2   ;;  %345 = vperm.xlu2 %1077, %v1293_v2  }
 0x38f   :  { %v1070_v0 = vpop.permute.xlu2 %1069 }
 0x390   :  { %v1071_v6 = vunpack.i.l.bf16 %v1070_v0  ;;  %v1072_v7 = vunpack.i.h.bf16 %v1070_v0 }
 0x397   :  { %v291_v12 = vpop.permute.xlu2 %290 }
 0x39f   :  { %v295_v19 = vpop.permute.xlu2 %294 }
 0x3a7   :  { %v1065_v62 = vpop.permute.xlu1 %1064 }
 0x3a8   :  { %v1066_v63 = vunpack.i.l.bf16 %v1065_v62  ;;  %v1067_v4 = vunpack.i.h.bf16 %v1065_v62  ;;  %v346_v28 = vpop.permute.xlu2 %345 }
 0x3aa   :  { %315 = vmatpush.msra.mxu2 %v1066_v63 }
 0x3ac   :  { %316 = vmatpush.msra.mxu2 %v1067_v4 }
 0x3ae   :  { %317 = vmatpush.msra.mxu2 %v1071_v6 }
 0x3af   :  { %v300_v11 = vpop.permute.xlu1 %299 }
 0x3b0   :  { %318 = vmatpush.msra.mxu2 %v1072_v7 }
 0x3b2   :  { %982 = vmatpush.msk.msra.mxu2 %vm1341_vm10, %v270_v55 }
 0x3b4   :  { %984 = vmatpush.msk.msra.mxu2 %vm1341_vm10, %v268_v54 }
 0x3b5   :  { %985 = vmatmul.msk.f32.vlgmr.msra.gmra.mxu2 %vm177_vm11, %v298_v10  ;;  %v404_v10 = vld [vmem:[%s1534_s3 + $0x8] sm:$0xff] }
 0x3b7   :  { %v342_v15 = vpop.permute.xlu1 %341 }
 0x3bd   :  { %986 = vmatmul.msk.f32.gmra.mxu2 %vm177_vm11, %v300_v11  ;;  %v403_v11 = vld [vmem:[%s1534_s3] sm:$0xff] }
 0x3c0   :  { %v336_v26 = vpop.permute.xlu1 %335 }
 0x438   :  { %v322_v13 = vpop.f32.mrf.mxu2 }
 0x439   :  { %v323_v16 = vadd.f32 %v322_v13, %v291_v12 }
 0x43b   :  { %v328_v18 = vadd.f32 %v323_v16, %v1318_v14  ;;  %v415_v14 = vld [vmem:[%s1534_s3 + $0x60] sm:$0xff] }
 0x43c   :  { %427 = vmatpush.msra.mxu3 %v415_v14 }
 0x43d   :  { %v338_v20 = vmul.f32 %v332_v17, %v328_v18 }
 0x43f   :  { %v348_v22 = vadd.f32 %v342_v15, %v338_v20 }
 0x440   :  { %v325_v23 = vpop.f32.mrf.mxu2 }
 0x441   :  { %v987_v24 = vmul.f32 -1.442695, %v348_v22  ;;  %v326_v25 = vadd.f32 %v325_v23, %v295_v19  ;;  %v1425_v19 = vld [vmem:[%s1532_s1 + $0x20] sm:$0xff] }
 0x443   :  { %1148 = vpow2.f32 %v987_v24  ;;  %v329_v27 = vadd.f32 %v326_v25, %v1321_v21  ;;  %v414_v21 = vld [vmem:[%s1534_s3 + $0x58] sm:$0xff]  ;;  %v1433_v24 = vld [vmem:[%s1532_s1 + $0x8] sm:$0xff] }
 0x444   :  { %428 = vmatpush.msra.mxu3 %v414_v21 }
 0x445   :  { %v339_v29 = vmul.f32 %v336_v26, %v329_v27  ;;  %v1235_v27 = vmov 9  }
 0x446   :  { %429 = vmatpush.msra.mxu3 %v413_v35  ;;  %1089 = vset.pattern.permute.xlu0 %v1235_v27 }
 0x447   :  { %v1373_v30 = vadd.f32 %v346_v28, %v339_v29  ;;  %v1236_v28 = vmov 12   ;;  %1088 = vset.pattern.permute.xlu2 %v1235_v27  ;;  %v1237_v29 = vmov 15  }
 0x448   :  { %430 = vmatpush.msra.mxu3 %v412_v36  ;;  %1090 = vset.pattern.permute.xlu1 %v1236_v28 }
 0x449   :  { %v1149_v32 = vpop.eup %1148  ;;  %v988_v33 = vmul.f32 -1.442695, %v1373_v30 }
 0x44a   :  { %v356_v34 = vadd.f32 1.0, %v1149_v32  ;;  %431 = vmatpush.msra.mxu3 %v411_v37 }
 0x44b   :  { %1150 = vpow2.f32 %v988_v33 }
 0x44c   :  { %1152 = vrcp.f32 %v356_v34  ;;  %432 = vmatpush.msra.mxu3 %v410_v39  ;;  %v369_v46 = vand.u32 2147483648, %v356_v34  ;;  %v367_v48 = vand.u32 2147483647, %v356_v34  ;;  %vm363_vm5 = vweird.f32 %v356_v34 }
 0x44e   :  { %433 = vmatpush.msra.mxu3 %v409_v43  ;;  %v370_v53 = vor.u32 1.1754944e-38, %v369_v46  ;;  %vm368_vm7 = vcmp.eq.f32.partialorder %v367_v48, 8.507059e+37 }
 0x450   :  { %434 = vmatpush.msra.mxu3 %v408_v45 }
 0x451   :  { %v1151_v38 = vpop.eup %1150 }
 0x452   :  { %v1153_v40 = vpop.eup %1152  ;;  %v357_v41 = vadd.f32 1.0, %v1151_v38  ;;  %435 = vmatpush.msra.mxu3 %v407_v49 }
 0x453   :  { %v359_v42 = vmul.f32 %v1153_v40, %v356_v34  ;;  %vm364_vm4 = vweird.f32 %v1153_v40 }
 0x454   :  { %1154 = vrcp.f32 %v357_v41  ;;  %vm365_vm6 = vmor %vm363_vm5, %vm364_vm4  ;;  %436 = vmatpush.msra.mxu3 %v406_v51  ;;  %v384_v60 = vand.u32 2147483648, %v357_v41  ;;  %v382_v62 = vand.u32 2147483647, %v357_v41  ;;  %vm378_vm12 = vweird.f32 %v357_v41 }
 0x455   :  { %v360_v44 = vsub.f32 1.0, %v359_v42 }
 0x456   :  { %437 = vmatpush.msra.mxu3 %v405_v56  ;;  %v385_v0 = vor.u32 1.1754944e-38, %v384_v60  ;;  %vm383_vm14 = vcmp.eq.f32.partialorder %v382_v62, 8.507059e+37 }
 0x457   :  { %v361_v47 = vmul.f32 %v1153_v40, %v360_v44 }
 0x458   :  { %438 = vmatpush.msra.mxu3 %v404_v10 }
 0x459   :  { %v362_v50 = vadd.f32 %v1153_v40, %v361_v47 }
 0x45a   :  { %v1155_v52 = vpop.eup %1154  ;;  %439 = vmatpush.msra.mxu3 %v403_v11 }
 0x45b   :  { %v374_v54 = vmul.f32 %v1155_v52, %v357_v41  ;;  %v366_v55 = vsel %vm365_vm6, %v1153_v40, %v362_v50  ;;  %vm379_vm8 = vweird.f32 %v1155_v52 }
 0x45c   :  { %v371_v57 = vsel %vm368_vm7, %v370_v53, %v366_v55  ;;  %vm380_vm13 = vmor %vm378_vm12, %vm379_vm8 }
 0x45d   :  { %v375_v58 = vsub.f32 1.0, %v374_v54  ;;  %v388_v59 = vmul.f32 %v371_v57, %v348_v22 }
 0x45f   :  { %v376_v61 = vmul.f32 %v1155_v52, %v375_v58  ;;  %392 = vrot.lane.b32.xlu0 %v388_v59, %s1221_s24 }
 0x461   :  { %v377_v63 = vadd.f32 %v1155_v52, %v376_v61 }
 0x463   :  { %v381_v4 = vsel %vm380_vm13, %v1155_v52, %v377_v63 }
 0x464   :  { %v386_v6 = vsel %vm383_vm14, %v385_v0, %v381_v4 }
 0x465   :  { %v389_v7 = vmul.f32 %v386_v6, %v1373_v30 }
 0x467   :  { %394 = vrot.lane.b32.xlu1 %v389_v7, %s1221_s24 }
 0x46f   :  { %471 = vrot.lane.b32.xlu1 %v1309_v8, %s1234_s18 }
 0x477   :  { %477 = vrot.lane.b32.xlu1 %v1425_v19, %s1234_s18 }
 0x47f   :  { %514 = vperm.xlu1 %1090, %v1293_v2  }
 0x487   :  { %1092 = vset.pattern.permute.xlu1 %v1237_v29 }
 0x488   :  { %524 = vperm.xlu1 %1092, %v1293_v2  }
 0x4d1   :  { %v393_v12 = vpop.permute.xlu0 %392 }
 0x4d2   :  { %v399_v13 = vsel %vm398_vm15, %v393_v12, 0.0 }
 0x4d3   :  { %v401_v15 = vmax.f32 %v388_v59, %v399_v13 }
 0x4d5   :  { %989 = vmatmul.msk.f32.vlgmr.msra.gmra.mxu3 %vm417_vm0, %v401_v15 }
 0x4d9   :  { %v395_v16 = vpop.permute.xlu1 %394 }
 0x4da   :  { %v400_v17 = vsel %vm398_vm15, %v395_v16, 0.0 }
 0x4db   :  { %v402_v18 = vmax.f32 %v389_v7, %v400_v17 }
 0x4dd   :  { %990 = vmatmul.msk.f32.gmra.mxu3 %vm417_vm0, %v402_v18 }
 0x4e1   :  { %v472_v31 = vpop.permute.xlu1 %471 }
 0x4e9   :  { %v478_v21 = vpop.permute.xlu1 %477 }
 0x4f1   :  { %v515_v40 = vpop.permute.xlu1 %514 }
 0x4fa   :  { %v525_v48 = vpop.permute.xlu1 %524 }
 0x558   :  { %v441_v20 = vpop.f32.mrf.mxu3 }
 0x560   :  { %v444_v22 = vpop.f32.mrf.mxu3 }
 0x561   :  { %v1083_v23 = vpack.i.bf16 %v441_v20, %v444_v22 }
 0x563   :  { %1084 = vrot.lane.b32.xlu0 %v1083_v23, %s1221_s24  ;;  %1079 = vrot.lane.b32.xlu2 %v1083_v23, %s1220_s23 }
 0x56b   :  { %475 = vrot.lane.b32.xlu0 %v1315_v9, %s1234_s18  ;;  %473 = vrot.lane.b32.xlu2 %v1433_v24, %s1234_s18 }
 0x573   :  { %462 = vperm.xlu0 %1089, %v1299_v3   ;;  %466 = vperm.xlu2 %1088, %v1293_v2  }
 0x57b   :  { %1091 = vset.pattern.permute.xlu2 %v1236_v28 }
 0x57c   :  { %510 = vperm.xlu2 %1091, %v1299_v3  }
 0x584   :  { %1093 = vset.pattern.permute.xlu2 %v1237_v29 }
 0x585   :  { %520 = vperm.xlu2 %1093, %v1299_v3  }
 0x5bd   :  { %v1080_v8 = vpop.permute.xlu2 %1079 }
 0x5be   :  { %v1081_v25 = vunpack.i.l.bf16 %v1080_v8  ;;  %v1082_v26 = vunpack.i.h.bf16 %v1080_v8 }
 0x5c0   :  { %496 = vmatpush.msrb.mxu0 %v1081_v25 }
 0x5c2   :  { %497 = vmatpush.msrb.mxu0 %v1082_v26 }
 0x5c5   :  { %v474_v32 = vpop.permute.xlu2 %473 }
 0x5c6   :  { %v480_v33 = vsel %vm479_vm1, %v472_v31, %v474_v32  ;;  %v1240_v31 = vmov 13  }
 0x5c7   :  { %1106 = vset.pattern.permute.xlu2 %v1240_v31 }
 0x5cd   :  { %v467_v36 = vpop.permute.xlu2 %466 }
 0x5d5   :  { %v1085_v9 = vpop.permute.xlu0 %1084 }
 0x5d6   :  { %v1086_v30 = vunpack.i.l.bf16 %v1085_v9  ;;  %v1087_v14 = vunpack.i.h.bf16 %v1085_v9  ;;  %v511_v37 = vpop.permute.xlu2 %510 }
 0x5d8   :  { %498 = vmatpush.msrb.mxu0 %v1086_v30  ;;  %v1239_v30 = vmov 10  }
 0x5d9   :  { %1105 = vset.pattern.permute.xlu1 %v1239_v30  ;;  %1104 = vset.pattern.permute.xlu0 %v1239_v30  ;;  %v1494_v30 = vld [vmem:[%s1533_s2] sm:$0xff] }
 0x5da   :  { %499 = vmatpush.msrb.mxu0 %v1087_v14  ;;  %v1241_v14 = vmov 16  }
 0x5dc   :  { %500 = vmatpush.msrb.mxu0 %v444_v22 }
 0x5dd   :  { %v476_v34 = vpop.permute.xlu0 %475 }
 0x5de   :  { %501 = vmatpush.msrb.mxu0 %v441_v20  ;;  %v481_v35 = vsel %vm479_vm1, %v476_v34, %v478_v21 }
 0x5df   :  { %991 = vmatmul.msk.f32.vlgmr.msrb.gmra.mxu0 %vm177_vm11, %v480_v33  ;;  %v521_v42 = vpop.permute.xlu2 %520 }
 0x5e5   :  { %v463_v38 = vpop.permute.xlu0 %462 }
 0x5e7   :  { %992 = vmatmul.msk.f32.gmra.mxu0 %vm177_vm11, %v481_v35 }
 0x65c   :  { %v503_v39 = vpop.f32.mrf.mxu0 }
 0x65d   :  { %v1445_v41 = vadd.f32 %v503_v39, %v463_v38 }
 0x65f   :  { %v517_v43 = vmul.f32 %v511_v37, %v1445_v41 }
 0x661   :  { %v527_v44 = vadd.f32 %v521_v42, %v517_v43 }
 0x663   :  { %v993_v45 = vmul.f32 -1.442695, %v527_v44 }
 0x664   :  { %v506_v46 = vpop.f32.mrf.mxu0 }
 0x665   :  { %1156 = vpow2.f32 %v993_v45  ;;  %v1448_v47 = vadd.f32 %v506_v46, %v467_v36 }
 0x667   :  { %v518_v49 = vmul.f32 %v515_v40, %v1448_v47 }
 0x669   :  { %v528_v50 = vadd.f32 %v525_v48, %v518_v49 }
 0x66b   :  { %v1157_v51 = vpop.eup %1156  ;;  %v994_v52 = vmul.f32 -1.442695, %v528_v50 }
 0x66c   :  { %v535_v53 = vadd.f32 1.0, %v1157_v51 }
 0x66d   :  { %1158 = vpow2.f32 %v994_v52 }
 0x66e   :  { %1160 = vrcp.f32 %v535_v53  ;;  %v548_v59 = vand.u32 2147483648, %v535_v53  ;;  %v546_v61 = vand.u32 2147483647, %v535_v53  ;;  %vm542_vm3 = vweird.f32 %v535_v53 }
 0x670   :  { %v549_v0 = vor.u32 1.1754944e-38, %v548_v59  ;;  %vm547_vm5 = vcmp.eq.f32.partialorder %v546_v61, 8.507059e+37 }
 0x673   :  { %v1159_v54 = vpop.eup %1158 }
 0x674   :  { %v1161_v55 = vpop.eup %1160  ;;  %v536_v56 = vadd.f32 1.0, %v1159_v54 }
 0x675   :  { %v538_v57 = vmul.f32 %v1161_v55, %v535_v53  ;;  %vm543_vm2 = vweird.f32 %v1161_v55 }
 0x676   :  { %1162 = vrcp.f32 %v536_v56  ;;  %vm544_vm4 = vmor %vm542_vm3, %vm543_vm2  ;;  %v563_v12 = vand.u32 2147483648, %v536_v56  ;;  %v561_v15 = vand.u32 2147483647, %v536_v56  ;;  %vm557_vm7 = vweird.f32 %v536_v56 }
 0x677   :  { %v539_v58 = vsub.f32 1.0, %v538_v57 }
 0x678   :  { %v564_v17 = vor.u32 1.1754944e-38, %v563_v12  ;;  %vm562_vm12 = vcmp.eq.f32.partialorder %v561_v15, 8.507059e+37 }
 0x679   :  { %v540_v60 = vmul.f32 %v1161_v55, %v539_v58 }
 0x67b   :  { %v541_v62 = vadd.f32 %v1161_v55, %v540_v60 }
 0x67c   :  { %v1163_v63 = vpop.eup %1162 }
 0x67d   :  { %v545_v4 = vsel %vm544_vm4, %v1161_v55, %v541_v62  ;;  %v553_v6 = vmul.f32 %v1163_v63, %v536_v56  ;;  %vm558_vm6 = vweird.f32 %v1163_v63 }
 0x67e   :  { %v550_v7 = vsel %vm547_vm5, %v549_v0, %v545_v4  ;;  %vm559_vm8 = vmor %vm557_vm7, %vm558_vm6  ;;  %vm734_vm5 = vcmask 326656  }
 0x67f   :  { %v567_v10 = vmul.f32 %v550_v7, %v527_v44  ;;  %v554_v11 = vsub.f32 1.0, %v553_v6 }
 0x681   :  { %v555_v13 = vmul.f32 %v1163_v63, %v554_v11  ;;  %571 = vrot.lane.b32.xlu1 %v567_v10, %s1225_s8 }
 0x683   :  { %v556_v16 = vadd.f32 %v1163_v63, %v555_v13 }
 0x685   :  { %v560_v18 = vsel %vm559_vm8, %v1163_v63, %v556_v16 }
 0x686   :  { %v565_v20 = vsel %vm562_vm12, %v564_v17, %v560_v18 }
 0x687   :  { %v568_v22 = vmul.f32 %v565_v20, %v528_v50 }
 0x689   :  { %573 = vrot.lane.b32.xlu0 %v568_v22, %s1225_s8  ;;  %601 = vrot.lane.b32.xlu1 %v1433_v24, %s1238_s22 }
 0x691   :  { %594 = vperm.xlu1 %1105, %v1299_v3  }
 0x699   :  { %1107 = vset.pattern.permute.xlu1 %v1240_v31  ;;  %v1244_v31 = vmov 14  }
 0x69a   :  { %633 = vperm.xlu1 %1107, %v1299_v3  }
 0x6f3   :  { %v572_v23 = vpop.permute.xlu1 %571 }
 0x6f4   :  { %v577_v25 = vsel %vm148_vm9, 0.0, %v572_v23 }
 0x6fb   :  { %v574_v8 = vpop.permute.xlu0 %573  ;;  %v602_v34 = vpop.permute.xlu1 %601 }
 0x6fc   :  { %v578_v26 = vsel %vm148_vm9, 0.0, %v574_v8 }
 0x6fd   :  { %v1099_v27 = vpack.i.bf16 %v577_v25, %v578_v26 }
 0x6ff   :  { %1100 = vrot.lane.b32.xlu0 %v1099_v27, %s1221_s24  ;;  %1095 = vrot.lane.b32.xlu2 %v1099_v27, %s1220_s23 }
 0x707   :  { %603 = vrot.lane.b32.xlu2 %v1425_v19, %s1238_s22  ;;  %598 = vperm.xlu0 %1104, %v1293_v2  }
 0x70f   :  { %637 = vperm.xlu2 %1106, %v1293_v2   ;;  %1109 = vset.pattern.permute.xlu0 %v1241_v14 }
 0x710   :  { %643 = vperm.xlu0 %1109, %v1299_v3   ;;  %v595_v3 = vpop.permute.xlu1 %594 }
 0x717   :  { %1108 = vset.pattern.permute.xlu2 %v1241_v14 }
 0x718   :  { %647 = vperm.xlu2 %1108, %v1293_v2   ;;  %v634_v2 = vpop.permute.xlu1 %633  ;;  %726 = vrot.lane.b32.xlu0 %v1433_v24, %s1242_s25 }
 0x719   :  { %1122 = vset.pattern.permute.xlu0 %v1244_v31 }
 0x759   :  { %v1096_v28 = vpop.permute.xlu2 %1095 }
 0x75a   :  { %v1097_v29 = vunpack.i.l.bf16 %v1096_v28  ;;  %v1098_v9 = vunpack.i.h.bf16 %v1096_v28  ;;  %v26_v28 = vld [vmem:[%s1532_s1 + $0x10] sm:$0xff] }
 0x75c   :  { %619 = vmatpush.msrb.mxu1 %v1097_v29  ;;  %v1243_v29 = vmov 11  }
 0x75d   :  { %1120 = vset.pattern.permute.xlu1 %v1243_v29  ;;  %1121 = vset.pattern.permute.xlu2 %v1243_v29 }
 0x75e   :  { %620 = vmatpush.msrb.mxu1 %v1098_v9  ;;  %v1488_v9 = vld [vmem:[%s1533_s2 + $0x8] sm:$0xff] }
 0x761   :  { %v604_v35 = vpop.permute.xlu2 %603 }
 0x769   :  { %v638_v38 = vpop.permute.xlu2 %637 }
 0x771   :  { %v1101_v32 = vpop.permute.xlu0 %1100 }
 0x772   :  { %v1102_v33 = vunpack.i.l.bf16 %v1101_v32  ;;  %v1103_v21 = vunpack.i.h.bf16 %v1101_v32  ;;  %v648_v48 = vpop.permute.xlu2 %647 }
 0x774   :  { %621 = vmatpush.msrb.mxu1 %v1102_v33 }
 0x776   :  { %622 = vmatpush.msrb.mxu1 %v1103_v21 }
 0x778   :  { %996 = vmatpush.msk.msrb.mxu1 %vm1341_vm10, %v574_v8 }
 0x779   :  { %v599_v36 = vpop.permute.xlu0 %598 }
 0x77a   :  { %998 = vmatpush.msk.msrb.mxu1 %vm1341_vm10, %v572_v23  ;;  %v29_v23 = vld [vmem:[%s1532_s1 + $0x28] sm:$0xff] }
 0x77b   :  { %999 = vmatmul.msk.f32.vlgmr.msrb.gmra.mxu1 %vm177_vm11, %v602_v34  ;;  %732 = vrot.lane.b32.xlu0 %v29_v23, %s1242_s25 }
 0x782   :  { %v644_v40 = vpop.permute.xlu0 %643 }
 0x783   :  { %1000 = vmatmul.msk.f32.gmra.mxu1 %vm177_vm11, %v604_v35  ;;  %771 = vperm.xlu0 %1122, %v1488_v9  }
 0x78a   :  { %v727_v35 = vpop.permute.xlu0 %726 }
 0x7f8   :  { %v626_v37 = vpop.f32.mrf.mxu1 }
 0x7f9   :  { %v627_v39 = vadd.f32 %v626_v37, %v595_v3  ;;  %v733_v37 = vpop.permute.xlu0 %732 }
 0x7fb   :  { %v640_v42 = vmul.f32 %v634_v2, %v627_v39 }
 0x7fd   :  { %v650_v43 = vadd.f32 %v644_v40, %v640_v42 }
 0x7ff   :  { %v1001_v44 = vmul.f32 -1.442695, %v650_v43 }
 0x800   :  { %v629_v45 = vpop.f32.mrf.mxu1 }
 0x801   :  { %1164 = vpow2.f32 %v1001_v44  ;;  %v630_v46 = vadd.f32 %v629_v45, %v599_v36 }
 0x803   :  { %v641_v49 = vmul.f32 %v638_v38, %v630_v46 }
 0x805   :  { %v651_v50 = vadd.f32 %v648_v48, %v641_v49 }
 0x807   :  { %v1165_v51 = vpop.eup %1164  ;;  %v1002_v52 = vmul.f32 -1.442695, %v651_v50 }
 0x808   :  { %v658_v53 = vadd.f32 1.0, %v1165_v51 }
 0x809   :  { %1166 = vpow2.f32 %v1002_v52 }
 0x80a   :  { %1168 = vrcp.f32 %v658_v53  ;;  %v671_v59 = vand.u32 2147483648, %v658_v53  ;;  %v669_v61 = vand.u32 2147483647, %v658_v53  ;;  %vm665_vm14 = vweird.f32 %v658_v53 }
 0x80c   :  { %v672_v0 = vor.u32 1.1754944e-38, %v671_v59  ;;  %vm670_vm0 = vcmp.eq.f32.partialorder %v669_v61, 8.507059e+37  ;;  %v1247_v61 = vmov 19  }
 0x80f   :  { %v1167_v54 = vpop.eup %1166 }
 0x810   :  { %v1169_v55 = vpop.eup %1168  ;;  %v659_v56 = vadd.f32 1.0, %v1167_v54 }
 0x811   :  { %v661_v57 = vmul.f32 %v1169_v55, %v658_v53  ;;  %vm666_vm13 = vweird.f32 %v1169_v55  ;;  %v772_v53 = vpop.permute.xlu0 %771 }
 0x812   :  { %1170 = vrcp.f32 %v659_v56  ;;  %vm667_vm15 = vmor %vm665_vm14, %vm666_vm13  ;;  %v686_v12 = vand.u32 2147483648, %v659_v56  ;;  %v684_v15 = vand.u32 2147483647, %v659_v56  ;;  %vm680_vm2 = vweird.f32 %v659_v56 }
 0x813   :  { %v662_v58 = vsub.f32 1.0, %v661_v57 }
 0x814   :  { %v687_v17 = vor.u32 1.1754944e-38, %v686_v12  ;;  %vm685_vm4 = vcmp.eq.f32.partialorder %v684_v15, 8.507059e+37 }
 0x815   :  { %v663_v60 = vmul.f32 %v1169_v55, %v662_v58 }
 0x817   :  { %v664_v62 = vadd.f32 %v1169_v55, %v663_v60  ;;  %v1246_v60 = vmov 18  }
 0x818   :  { %v1171_v63 = vpop.eup %1170  ;;  %1127 = vset.pattern.permute.xlu0 %v1246_v60 }
 0x819   :  { %v668_v4 = vsel %vm667_vm15, %v1169_v55, %v664_v62  ;;  %v676_v6 = vmul.f32 %v1171_v63, %v659_v56  ;;  %vm681_vm1 = vweird.f32 %v1171_v63 }
 0x81a   :  { %v673_v7 = vsel %vm670_vm0, %v672_v0, %v668_v4  ;;  %vm682_vm3 = vmor %vm680_vm2, %vm681_vm1 }
 0x81b   :  { %v690_v10 = vmul.f32 %v673_v7, %v650_v43  ;;  %v677_v11 = vsub.f32 1.0, %v676_v6 }
 0x81d   :  { %v678_v13 = vmul.f32 %v1171_v63, %v677_v11  ;;  %694 = vrot.lane.b32.xlu2 %v690_v10, %s1225_s8 }
 0x81f   :  { %v679_v16 = vadd.f32 %v1171_v63, %v678_v13 }
 0x821   :  { %v683_v18 = vsel %vm682_vm3, %v1171_v63, %v679_v16 }
 0x822   :  { %v688_v20 = vsel %vm685_vm4, %v687_v17, %v683_v18 }
 0x823   :  { %v691_v22 = vmul.f32 %v688_v20, %v651_v50 }
 0x825   :  { %696 = vrot.lane.b32.xlu1 %v691_v22, %s1225_s8 }
 0x877   :  { %v695_v24 = vpop.permute.xlu2 %694 }
 0x878   :  { %v700_v25 = vsel %vm148_vm9, 0.0, %v695_v24 }
 0x897   :  { %v697_v8 = vpop.permute.xlu1 %696 }
 0x898   :  { %v701_v26 = vsel %vm148_vm9, 0.0, %v697_v8 }
 0x899   :  { %v1115_v27 = vpack.i.bf16 %v700_v25, %v701_v26 }
 0x89b   :  { %1116 = vrot.lane.b32.xlu2 %v1115_v27, %s1221_s24  ;;  %1111 = vrot.lane.b32.xlu1 %v1115_v27, %s1220_s23 }
 0x8a3   :  { %728 = vrot.lane.b32.xlu1 %v26_v28, %s1242_s25  ;;  %730 = vrot.lane.b32.xlu2 %v1425_v19, %s1242_s25  ;;  %v1245_v19 = vmov 17  }
 0x8ab   :  { %721 = vperm.xlu1 %1120, %v1488_v9   ;;  %717 = vperm.xlu2 %1121, %v1494_v30  }
 0x8b3   :  { %1123 = vset.pattern.permute.xlu1 %v1244_v31  ;;  %1124 = vset.pattern.permute.xlu2 %v1245_v19 }
 0x8b4   :  { %767 = vperm.xlu1 %1123, %v1494_v30   ;;  %781 = vperm.xlu2 %1124, %v1488_v9  }
 0x8bc   :  { %1125 = vset.pattern.permute.xlu1 %v1245_v19  ;;  %1126 = vset.pattern.permute.xlu2 %v1246_v60 }
 0x8bd   :  { %777 = vperm.xlu1 %1125, %v1494_v30  }
 0x8c5   :  { %1128 = vset.pattern.permute.xlu1 %v1247_v61 }
 0x8f5   :  { %v1117_v33 = vpop.permute.xlu2 %1116 }
 0x8f6   :  { %v1118_v34 = vunpack.i.l.bf16 %v1117_v33  ;;  %v1119_v3 = vunpack.i.h.bf16 %v1117_v33 }
 0x8fd   :  { %v731_v38 = vpop.permute.xlu2 %730 }
 0x8fe   :  { %v736_v39 = vsel %vm734_vm5, %v731_v38, %v733_v37 }
 0x905   :  { %v718_v43 = vpop.permute.xlu2 %717 }
 0x90d   :  { %v1112_v14 = vpop.permute.xlu1 %1111 }
 0x90e   :  { %v1113_v32 = vunpack.i.l.bf16 %v1112_v14  ;;  %v1114_v21 = vunpack.i.h.bf16 %v1112_v14  ;;  %v782_v55 = vpop.permute.xlu2 %781 }
 0x910   :  { %751 = vmatpush.msrb.mxu2 %v1113_v32 }
 0x912   :  { %752 = vmatpush.msrb.mxu2 %v1114_v21 }
 0x914   :  { %753 = vmatpush.msrb.mxu2 %v1118_v34 }
 0x915   :  { %v729_v36 = vpop.permute.xlu1 %728 }
 0x916   :  { %754 = vmatpush.msrb.mxu2 %v1119_v3  ;;  %v735_v2 = vsel %vm734_vm5, %v727_v35, %v729_v36 }
 0x918   :  { %1004 = vmatpush.msk.msrb.mxu2 %vm1341_vm10, %v697_v8 }
 0x91a   :  { %1006 = vmatpush.msk.msrb.mxu2 %vm1341_vm10, %v695_v24 }
 0x91b   :  { %1007 = vmatmul.msk.f32.vlgmr.msrb.gmra.mxu2 %vm177_vm11, %v735_v2 }
 0x91d   :  { %v722_v40 = vpop.permute.xlu1 %721 }
 0x923   :  { %1008 = vmatmul.msk.f32.gmra.mxu2 %vm177_vm11, %v736_v39 }
 0x926   :  { %v768_v42 = vpop.permute.xlu1 %767 }
 0x92f   :  { %v778_v48 = vpop.permute.xlu1 %777 }
 0x99e   :  { %v758_v44 = vpop.f32.mrf.mxu2 }
 0x99f   :  { %v759_v45 = vadd.f32 %v758_v44, %v718_v43  ;;  %v913_v44 = vld [vmem:[%s1536_s5] sm:$0xf] }
 0x9a1   :  { %v764_v46 = vadd.f32 %v759_v45, %v1445_v41 }
 0x9a3   :  { %v774_v49 = vmul.f32 %v768_v42, %v764_v46 }
 0x9a5   :  { %v784_v50 = vadd.f32 %v778_v48, %v774_v49 }
 0x9a6   :  { %v761_v51 = vpop.f32.mrf.mxu2 }
 0x9a7   :  { %v1009_v5 = vmul.f32 -1.442695, %v784_v50  ;;  %v762_v52 = vadd.f32 %v761_v51, %v722_v40 }
 0x9a9   :  { %1172 = vpow2.f32 %v1009_v5  ;;  %v765_v54 = vadd.f32 %v762_v52, %v1448_v47 }
 0x9ab   :  { %v775_v56 = vmul.f32 %v772_v53, %v765_v54 }
 0x9ad   :  { %v785_v57 = vadd.f32 %v782_v55, %v775_v56 }
 0x9af   :  { %v1173_v58 = vpop.eup %1172  ;;  %v1010_v59 = vmul.f32 -1.442695, %v785_v57 }
 0x9b0   :  { %v792_v41 = vadd.f32 1.0, %v1173_v58 }
 0x9b1   :  { %1174 = vpow2.f32 %v1010_v59 }
 0x9b2   :  { %1176 = vrcp.f32 %v792_v41  ;;  %v805_v47 = vand.u32 2147483648, %v792_v41  ;;  %v803_v10 = vand.u32 2147483647, %v792_v41  ;;  %vm799_vm11 = vweird.f32 %v792_v41 }
 0x9b4   :  { %v806_v13 = vor.u32 1.1754944e-38, %v805_v47  ;;  %vm804_vm7 = vcmp.eq.f32.partialorder %v803_v10, 8.507059e+37 }
 0x9b7   :  { %v1175_v62 = vpop.eup %1174 }
 0x9b8   :  { %v1177_v63 = vpop.eup %1176  ;;  %v793_v0 = vadd.f32 1.0, %v1175_v62 }
 0x9b9   :  { %v795_v4 = vmul.f32 %v1177_v63, %v792_v41  ;;  %vm800_vm10 = vweird.f32 %v1177_v63 }
 0x9ba   :  { %1178 = vrcp.f32 %v793_v0  ;;  %vm801_vm6 = vmor %vm799_vm11, %vm800_vm10  ;;  %v820_v22 = vand.u32 2147483648, %v793_v0  ;;  %v818_v24 = vand.u32 2147483647, %v793_v0  ;;  %vm814_vm12 = vweird.f32 %v793_v0 }
 0x9bb   :  { %v796_v6 = vsub.f32 1.0, %v795_v4 }
 0x9bc   :  { %v821_v25 = vor.u32 1.1754944e-38, %v820_v22  ;;  %vm819_vm14 = vcmp.eq.f32.partialorder %v818_v24, 8.507059e+37 }
 0x9bd   :  { %v797_v7 = vmul.f32 %v1177_v63, %v796_v6 }
 0x9bf   :  { %v798_v11 = vadd.f32 %v1177_v63, %v797_v7 }
 0x9c0   :  { %v1179_v12 = vpop.eup %1178 }
 0x9c1   :  { %v802_v15 = vsel %vm801_vm6, %v1177_v63, %v798_v11  ;;  %v810_v16 = vmul.f32 %v1179_v12, %v793_v0  ;;  %vm815_vm8 = vweird.f32 %v1179_v12 }
 0x9c2   :  { %v807_v17 = vsel %vm804_vm7, %v806_v13, %v802_v15  ;;  %vm816_vm13 = vmor %vm814_vm12, %vm815_vm8 }
 0x9c3   :  { %v824_v18 = vmul.f32 %v807_v17, %v784_v50  ;;  %v811_v20 = vsub.f32 1.0, %v810_v16 }
 0x9c5   :  { %v812_v23 = vmul.f32 %v1179_v12, %v811_v20  ;;  %844 = vrot.lane.b32.xlu1 %v824_v18, %s1226_s9  ;;  %836 = vrot.lane.b32.xlu2 %v824_v18, %s1220_s23 }
 0x9c6   :  { %828 = vrot.lane.b32.xlu0 %v824_v18, %s1221_s24 }
 0x9c7   :  { %v813_v8 = vadd.f32 %v1179_v12, %v812_v23 }
 0x9c9   :  { %v817_v26 = vsel %vm816_vm13, %v1179_v12, %v813_v8  ;;  %v912_v12 = vld [vmem:[%s1535_s4] sm:$0xf]  ;;  %s960_s4 = sshll.u32 %s1537_s6, 4  ;;  %s961_s4 = int_to_ptr.hbm [resolvable:$true] %s960_s4 }
 0x9ca   :  { %v822_v27 = vsel %vm819_vm14, %v821_v25, %v817_v26 }
 0x9cb   :  { %v825_v28 = vmul.f32 %v822_v27, %v785_v57 }
 0x9cd   :  { %838 = vrot.lane.b32.xlu1 %v825_v28, %s1220_s23  ;;  %830 = vrot.lane.b32.xlu2 %v825_v28, %s1221_s24  ;;  %s1248_s24 = smov [#allocation2]  }
 0x9ce   :  { %846 = vrot.lane.b32.xlu0 %v825_v28, %s1226_s9  ;;  %s958_s9 = sshll.u32 %s1248_s24, 4  ;;  %s959_s9 = int_to_ptr.vmem [resolvable:$true] %s958_s9 }
 0x9d5   :  { %867 = vperm.xlu1 %1128, %v1488_v9   ;;  %857 = vperm.xlu2 %1126, %v1488_v9  }
 0x9d6   :  { %853 = vperm.xlu0 %1127, %v1494_v30  }
 0x9dd   :  { %1129 = vset.pattern.permute.xlu2 %v1247_v61  ;;  %1130 = vset.pattern.permute.xlu1 %v1222_v1 }
 0x9de   :  { %863 = vperm.xlu2 %1129, %v1494_v30   ;;  %1131 = vset.pattern.permute.xlu0 %v1222_v1 }
 0x9df   :  { %916 = vperm.xlu1 %1130, %v913_v44  }
 0xa1f   :  { %v837_v29 = vpop.permute.xlu2 %836 }
 0xa27   :  { %v831_v31 = vpop.permute.xlu2 %830 }
 0xa28   :  { %v835_v32 = vmax.f32 %v825_v28, %v831_v31 }
 0xa2f   :  { %v858_v33 = vpop.permute.xlu2 %857 }
 0xa37   :  { %v845_v19 = vpop.permute.xlu1 %844 }
 0xa38   :  { %v829_v14 = vpop.permute.xlu0 %828  ;;  %v864_v30 = vpop.permute.xlu2 %863 }
 0xa39   :  { %v834_v21 = vmax.f32 %v824_v18, %v829_v14 }
 0xa3b   :  { %v842_v36 = vmax.f32 %v834_v21, %v837_v29 }
 0xa3d   :  { %v850_v38 = vmax.f32 %v842_v36, %v845_v19 }
 0xa3f   :  { %v839_v34 = vpop.permute.xlu1 %838 }
 0xa40   :  { %v843_v35 = vmax.f32 %v835_v32, %v839_v34  ;;  %v847_v3 = vpop.permute.xlu0 %846 }
 0xa42   :  { %v851_v9 = vmax.f32 %v843_v35, %v847_v3 }
 0xa44   :  { %v861_v2 = vmul.f32 %v858_v33, %v851_v9 }
 0xa47   :  { %v868_v37 = vpop.permute.xlu1 %867 }
 0xa48   :  { %v871_v39 = vadd.f32 %v868_v37, %v861_v2  ;;  %v854_v40 = vpop.permute.xlu0 %853 }
 0xa49   :  { %v860_v42 = vmul.f32 %v854_v40, %v850_v38 }
 0xa4a   :  { %v1012_v1 = vmul.f32 -1.442695, %v871_v39 }
 0xa4b   :  { %v870_v43 = vadd.f32 %v864_v30, %v860_v42 }
 0xa4c   :  { %1180 = vpow2.f32 %v1012_v1 }
 0xa4d   :  { %v1011_v45 = vmul.f32 -1.442695, %v870_v43 }
 0xa4f   :  { %1182 = vpow2.f32 %v1011_v45 }
 0xa51   :  { %v917_v13 = vpop.permute.xlu1 %916 }
 0xa52   :  { %v1181_v46 = vpop.eup %1180 }
 0xa53   :  { %v879_v48 = vadd.f32 1.0, %v1181_v46 }
 0xa55   :  { %v1183_v49 = vpop.eup %1182  ;;  %1184 = vrcp.f32 %v879_v48  ;;  %v906_v54 = vand.u32 2147483648, %v879_v48  ;;  %v904_v57 = vand.u32 2147483647, %v879_v48  ;;  %vm900_vm0 = vweird.f32 %v879_v48 }
 0xa56   :  { %v878_v50 = vadd.f32 1.0, %v1183_v49 }
 0xa57   :  { %v907_v61 = vor.u32 1.1754944e-38, %v906_v54  ;;  %vm905_vm3 = vcmp.eq.f32.partialorder %v904_v57, 8.507059e+37 }
 0xa58   :  { %1186 = vrcp.f32 %v878_v50  ;;  %v891_v60 = vand.u32 2147483648, %v878_v50  ;;  %v889_v62 = vand.u32 2147483647, %v878_v50  ;;  %vm885_vm4 = vweird.f32 %v878_v50 }
 0xa5a   :  { %v892_v47 = vor.u32 1.1754944e-38, %v891_v60  ;;  %vm890_vm10 = vcmp.eq.f32.partialorder %v889_v62, 8.507059e+37 }
 0xa5b   :  { %v1185_v51 = vpop.eup %1184 }
 0xa5c   :  { %v896_v5 = vmul.f32 %v1185_v51, %v879_v48  ;;  %vm901_vm15 = vweird.f32 %v1185_v51 }
 0xa5d   :  { %vm902_vm1 = vmor %vm900_vm0, %vm901_vm15 }
 0xa5e   :  { %v1187_v52 = vpop.eup %1186  ;;  %v897_v53 = vsub.f32 1.0, %v896_v5 }
 0xa5f   :  { %v881_v55 = vmul.f32 %v1187_v52, %v878_v50  ;;  %vm886_vm2 = vweird.f32 %v1187_v52 }
 0xa60   :  { %v898_v56 = vmul.f32 %v1185_v51, %v897_v53  ;;  %vm887_vm5 = vmor %vm885_vm4, %vm886_vm2 }
 0xa61   :  { %v882_v58 = vsub.f32 1.0, %v881_v55 }
 0xa62   :  { %v899_v59 = vadd.f32 %v1185_v51, %v898_v56 }
 0xa63   :  { %v883_v41 = vmul.f32 %v1187_v52, %v882_v58 }
 0xa64   :  { %v903_v63 = vsel %vm902_vm1, %v1185_v51, %v899_v59 }
 0xa65   :  { %v908_v0 = vsel %vm905_vm3, %v907_v61, %v903_v63  ;;  %v884_v4 = vadd.f32 %v1187_v52, %v883_v41 }
 0xa66   :  { %v911_v6 = vmul.f32 %v908_v0, %v871_v39 }
 0xa67   :  { %v888_v7 = vsel %vm887_vm5, %v1187_v52, %v884_v4 }
 0xa68   :  { %v893_v10 = vsel %vm890_vm10, %v892_v47, %v888_v7  ;;  %936 = vmatpush.msra.mxu0 %v911_v6 }
 0xa69   :  { %v910_v11 = vmul.f32 %v893_v10, %v870_v43 }
 0xa6b   :  { %937 = vmatpush.msra.mxu0 %v910_v11 }
 0xa6c   :  { %1013 = vmatmul.msk.f32.vlgmr.msra.gmra.mxu0 %vm148_vm9, %v912_v12  ;;  %vm951_vm9 = vcmask 60416  }
 0xae9   :  { %v939_v15 = vpop.f32.mrf.mxu0 }
 0xaea   :  { %v940_v16 = vadd.f32 %v939_v15, %v917_v13 }
 0xaec   :  { %v943_v17 = vand.u32 2147483647, %v940_v16  ;;  %v942_v8 = vmax.f32 %v940_v16, 0.0 }
 0xaee   :  { %v944_v18 = vsub.f32 0.0, %v943_v17 }
 0xaf0   :  { %v945_v20 = vmul.f32 1.442695, %v944_v18 }
 0xaf2   :  { %1188 = vpow2.f32 %v945_v20 }
 0xaf8   :  { %v1189_v22 = vpop.eup %1188 }
 0xaf9   :  { %v947_v23 = vadd.f32 1.0, %v1189_v22 }
 0xafb   :  { %1190 = vlog2.f32 %v947_v23 }
 0xb01   :  { %v1191_v24 = vpop.eup %1190 }
 0xb02   :  { %v949_v25 = vmul.f32 0.6931472, %v1191_v24 }
 0xb04   :  { %v950_v26 = vadd.f32 %v949_v25, %v942_v8 }
 0xb06   :  { %952 = vst.msk [vmem:[#allocation2] sm:$0xf] %vm951_vm9, %v950_v26 }
 0xb07   :  { %963 = dma.vmem_to_hbm [thread:$0]  %s959_s9, 64, %s961_s4, [#allocation3]  }
 0xb08   :  { %1218 = dma.done.wait [#allocation3], 64  }
 0xb09   :  { %1219 = vsyncadd [#allocation3], 4294967232 }
 0xb0a   :  { %968 = vsyncpa [#allocation3], 1 }

</bundles_post_ra>
